<compile_context>
chip_gen: v7x
topology: tpu7x:2x2x1
jax: 0.10.0
libtpu: 0.0.40
codegen_flags: <defaults>
</compile_context>

<pallas_src>
import functools

import jax
import jax.numpy as jnp
import numpy as np
from jax.experimental import pallas as pl
from jax.experimental.pallas import tpu as pltpu

LAYERS_ENC = 2   # matches `layers_enc = 2` in the PyTorch script


# ---------------------------------------------------------------------------
# Kernel 1: hoisted input projection.
#   For n_in input streams x_i (M, K):
#     gx_f = sum_i x_i @ Wf_i + b_f     (M, 4H)
#     gx_b = sum_i x_i @ Wb_i + b_b     (M, 4H)
#   Fully parallel, M-tiled grid; bf16 weights, bf16 activation operands,
#   f32 accumulation; two lane-dense outputs (one per direction).
# ---------------------------------------------------------------------------
def _input_proj_kernel(*refs, n_in):
    xs = refs[:n_in]
    wf_ref, wb_ref, bf_ref, bb_ref, of_ref, ob_ref = refs[n_in:]
    gf = bf_ref[...]                 # (1, 4H) f32, broadcasts against (TM, 4H)
    gb = bb_ref[...]
    for i in range(n_in):
        x = xs[i][...].astype(jnp.bfloat16)
        gf = gf + jnp.dot(x, wf_ref[i], preferred_element_type=jnp.float32)
        gb = gb + jnp.dot(x, wb_ref[i], preferred_element_type=jnp.float32)
    of_ref[...] = gf
    ob_ref[...] = gb


def input_projection(xs, wf, wb, bf, bb, *, tm_target=512):
    """xs: list of (M, K_i) f32; wf/wb: (n_in, K, 4H) bf16; bf/bb: (1, 4H) f32.

    Returns (gx_f, gx_b), each (M, 4H) f32.
    """
    n_in, k_pad, g = wf.shape
    assert len(xs) == n_in
    m = xs[0].shape[0]

    # Zero-pad the contraction axis of each stream to the (already padded)
    # weight row count; padded rows of W are zero, so results are unchanged.
    xs = [x if x.shape[1] == k_pad else jnp.pad(x, ((0, 0), (0, k_pad - x.shape[1])))
          for x in xs]

    # M-tiled grid (review item): pipeline HBM reads behind the MXU at large M.
    m8 = -(-m // 8) * 8
    if m8 <= tm_target:
        tm, m_pad = m8, m8
    else:
        tm = tm_target
        m_pad = -(-m // tm) * tm
    if m_pad != m:
        xs = [jnp.pad(x, ((0, m_pad - m), (0, 0))) for x in xs]

    kernel = functools.partial(_input_proj_kernel, n_in=n_in)
    gx_f, gx_b = pl.pallas_call(
        kernel,
        out_shape=(jax.ShapeDtypeStruct((m_pad, g), jnp.float32),
                   jax.ShapeDtypeStruct((m_pad, g), jnp.float32)),
        grid_spec=pltpu.PrefetchScalarGridSpec(
            num_scalar_prefetch=0,
            grid=(m_pad // tm,),
            in_specs=(
                [pl.BlockSpec((tm, k_pad), lambda i: (i, 0)) for _ in range(n_in)]
                + [pl.BlockSpec((n_in, k_pad, g), lambda i: (0, 0, 0)),   # Wf (bf16)
                   pl.BlockSpec((n_in, k_pad, g), lambda i: (0, 0, 0)),   # Wb (bf16)
                   pl.BlockSpec((1, g), lambda i: (0, 0)),                # b_f
                   pl.BlockSpec((1, g), lambda i: (0, 0))]                # b_b
            ),
            out_specs=[pl.BlockSpec((tm, g), lambda i: (i, 0)),
                       pl.BlockSpec((tm, g), lambda i: (i, 0))],
        ),
        compiler_params=pltpu.CompilerParams(
            dimension_semantics=("parallel",)),
    )(*xs, wf, wb, bf, bb)
    return gx_f[:m], gx_b[:m]


# ---------------------------------------------------------------------------
# Kernel 2: fused bidirectional recurrence for one LSTM layer.
#   grid = (T // tc,)  walked sequentially ("arbitrary").
#   Per grid step: forward direction consumes time chunk s (local order j),
#   backward direction consumes time chunk S-1-s (local order tc-1-j), both
#   carries live in VMEM scratch across grid steps.  Per time step there is a
#   SINGLE MXU matmul: [h_f | h_b] (B, 2H) @ block-diag W_hh (2H, 8H).
# ---------------------------------------------------------------------------
def _bilstm_layer_kernel(gxf_ref, gxb_ref, whh_ref, h0_ref, c0_ref,
                         outf_ref, outb_ref, hfin_ref, cfin_ref,
                         h_sc, c_sc, *, hidden, tc):
    H = hidden
    G = 4 * H
    s = pl.program_id(0)

    @pl.when(s == 0)
    def _():
        h_sc[...] = h0_ref[...]          # (B, 2H) = [h0_fwd | h0_bwd]
        c_sc[...] = c0_ref[...]          # (2, B, H)

    w_bd = whh_ref[...]                  # (2H, 8H) bf16, no per-step cast
    h_cat = h_sc[...]                    # (B, 2H) f32 carry
    c_f = c_sc[0]
    c_b = c_sc[1]

    def cell_update(gates, c_prev):
        # Full-width transcendentals over (B, 4H), then slice i/f/g/o
        # (PyTorch gate order i, f, g, o).
        sg = jax.nn.sigmoid(gates)
        tg = jnp.tanh(gates)
        i = sg[:, 0 * H:1 * H]
        f = sg[:, 1 * H:2 * H]
        o = sg[:, 3 * H:4 * H]
        g = tg[:, 2 * H:3 * H]
        c_new = f * c_prev + i * g
        h_new = o * jnp.tanh(c_new)
        return h_new, c_new

    h_f = h_b = None
    # Statically unrolled time chunk (tc is a small Python int), amortizing the
    # ~0.35 us per-grid-step pipeline overhead over tc steps.
    for j in range(tc):
        jb = tc - 1 - j
        # Single fused MXU push for both directions (block-diagonal W_hh).
        hh = jnp.dot(h_cat.astype(jnp.bfloat16), w_bd,
                     preferred_element_type=jnp.float32)        # (B, 8H) f32
        g_f = gxf_ref[j] + hh[:, :G]     # fwd gates, global time s*tc + j
        g_b = gxb_ref[jb] + hh[:, G:]    # bwd gates, global time T-1-(s*tc+j)
        h_f, c_f = cell_update(g_f, c_f)
        h_b, c_b = cell_update(g_b, c_b)
        outf_ref[j] = h_f
        outb_ref[jb] = h_b
        h_cat = jnp.concatenate([h_f, h_b], axis=-1)            # (B, 2H)

    # Persist carries for the next chunk.
    h_sc[...] = h_cat
    c_sc[0] = c_f
    c_sc[1] = c_b

    # Final states written once, at the last grid step only.  The constant-
    # index hfin/cfin output blocks stay VMEM-resident across the grid and are
    # flushed to HBM after the final step (standard Pallas revisit behavior);
    # earlier steps never touch them.
    @pl.when(s == pl.num_programs(0) - 1)
    def _():
        hfin_ref[0] = h_f
        hfin_ref[1] = h_b
        cfin_ref[0] = c_f
        cfin_ref[1] = c_b


def bilstm_layer(gx_f, gx_b, whh_bd, h0cat, c0, *, tc):
    """One bidirectional LSTM layer given precomputed input pre-activations.

    gx_f, gx_b : (T, B, 4H) f32 pre-activations (x @ W_ih^T + b) per direction
    whh_bd     : (2H, 8H) bf16 block-diagonal recurrent weight
    h0cat      : (B, 2H) f32 initial hidden, [fwd | bwd] along lanes
    c0         : (2, B, H) f32 initial cell, [fwd, bwd]
    returns out_fwd (T,B,H), out_bwd (T,B,H), h_n (2,B,H), c_n (2,B,H)
    """
    T, B, G = gx_f.shape
    H = G // 4
    assert whh_bd.shape == (2 * H, 8 * H)
    # TODO(synk): no ragged/padded-sequence handling; padded steps would
    # corrupt h_n/c_n unless masked.
    assert T % tc == 0, "time chunk must divide sequence length"
    S = T // tc

    kernel = functools.partial(_bilstm_layer_kernel, hidden=H, tc=tc)

    out_shapes = (
        jax.ShapeDtypeStruct((T, B, H), jnp.float32),   # forward hidden sequence
        jax.ShapeDtypeStruct((T, B, H), jnp.float32),   # backward hidden sequence
        jax.ShapeDtypeStruct((2, B, H), jnp.float32),   # h_n [fwd, bwd]
        jax.ShapeDtypeStruct((2, B, H), jnp.float32),   # c_n [fwd, bwd]
    )

    # VMEM budget derived from the actual live set (not a blanket 32 MiB):
    # double-buffered gx chunks + double-buffered output chunks + W_hh + carries.
    vmem_est = (
        2 * 2 * tc * B * G * 4          # gx_f / gx_b chunks, 2 buffers each
        + 2 * 2 * tc * B * H * 4        # outf / outb chunks, 2 buffers each
        + (2 * H) * (8 * H) * 2         # block-diagonal W_hh (bf16)
        + B * 2 * H * 4 + 2 * B * H * 4 # carries
        + 4 * 2 * B * H * 4             # h0/c0 in, hfin/cfin out
    )
    vmem_limit = int(min(64 * 1024 * 1024, max(16 * 1024 * 1024, 2 * vmem_est)))

    return pl.pallas_call(
        kernel,
        out_shape=out_shapes,
        grid_spec=pltpu.PrefetchScalarGridSpec(
            num_scalar_prefetch=0,
            grid=(S,),
            in_specs=[
                pl.BlockSpec((tc, B, G), lambda s: (s, 0, 0)),          # gx fwd
                pl.BlockSpec((tc, B, G), lambda s: (S - 1 - s, 0, 0)),  # gx bwd (rev chunks)
                pl.BlockSpec((2 * H, 8 * H), lambda s: (0, 0)),         # W_hh block-diag
                pl.BlockSpec((B, 2 * H), lambda s: (0, 0)),             # h0 [fwd|bwd]
                pl.BlockSpec((2, B, H), lambda s: (0, 0, 0)),           # c0
            ],
            out_specs=[
                pl.BlockSpec((tc, B, H), lambda s: (s, 0, 0)),          # fwd h_seq
                pl.BlockSpec((tc, B, H), lambda s: (S - 1 - s, 0, 0)),  # bwd h_seq
                pl.BlockSpec((2, B, H), lambda s: (0, 0, 0)),           # h_n
                pl.BlockSpec((2, B, H), lambda s: (0, 0, 0)),           # c_n
            ],
            scratch_shapes=[
                pltpu.VMEM((B, 2 * H), jnp.float32),     # h carry [fwd | bwd]
                pltpu.VMEM((2, B, H), jnp.float32),      # c carry [fwd, bwd]
            ],
        ),
        compiler_params=pltpu.CompilerParams(
            dimension_semantics=("arbitrary",),           # sequential recurrence
            vmem_limit_bytes=vmem_limit,
        ),
    )(gx_f, gx_b, whh_bd, h0cat, c0)


# ---------------------------------------------------------------------------
# BiEncoderRNN forward (glue in plain JAX, hot paths in the kernels above).
# ---------------------------------------------------------------------------
def bi_encoder_rnn_forward(x, hidden, cell_state, params, *, tc=None):
    """Equivalent of BiEncoderRNN.forward.

    x          : (T, B, input_dim)
    hidden     : (2 * LAYERS_ENC, B, H)
    cell_state : (2 * LAYERS_ENC, B, H)
    returns output_enc (T, B, 2H), (hidden_enc, cell_state_enc)
    """
    T, B, _ = x.shape
    if tc is None:
        tc = max(d for d in range(1, min(T, 32) + 1) if T % d == 0)

    ins = [x.reshape(T * B, -1)]
    out_f = out_b = None
    h_fins, c_fins = [], []
    for layer in range(LAYERS_ENC):
        p = params[layer]
        H = p["whh_bd"].shape[0] // 2
        # Hoisted, fully parallel input projection (per-direction outputs).
        gx_f, gx_b = input_projection(ins, p["wih_f"], p["wih_b"],
                                      p["b_f"], p["b_b"])
        gx_f = gx_f.reshape(T, B, 4 * H)
        gx_b = gx_b.reshape(T, B, 4 * H)

        h0 = hidden[2 * layer:2 * layer + 2]
        c0 = cell_state[2 * layer:2 * layer + 2]
        h0cat = jnp.concatenate([h0[0], h0[1]], axis=-1)      # (B, 2H), tiny

        out_f, out_b, h_n, c_n = bilstm_layer(gx_f, gx_b, p["whh_bd"],
                                              h0cat, c0, tc=tc)
        # No inter-layer (T,B,2H) concat: feed both direction streams straight
        # into the next layer's input projection.
        ins = [out_f.reshape(T * B, H), out_b.reshape(T * B, H)]
        h_fins.append(h_n)
        c_fins.append(c_n)

    output_enc = jnp.concatenate([out_f, out_b], axis=-1)     # only the final output
    return output_enc, (jnp.concatenate(h_fins, axis=0),
                        jnp.concatenate(c_fins, axis=0))


def init_params(key, input_dim, hidden):
    """PyTorch-LSTM-shaped params, U(-1/sqrt(H), 1/sqrt(H)), pre-packed for the
    kernels (bf16 weights, per-stream W_ih stacks, block-diagonal W_hh)."""
    bound = 1.0 / np.sqrt(hidden)
    params = []
    for layer in range(LAYERS_ENC):
        din = input_dim if layer == 0 else 2 * hidden
        wih_t, whh_t, bias = [], [], []
        for _direction in range(2):
            key, k1, k2, k3, k4 = jax.random.split(key, 5)
            w_ih = jax.random.uniform(k1, (4 * hidden, din), jnp.float32, -bound, bound)
            w_hh = jax.random.uniform(k2, (4 * hidden, hidden), jnp.float32, -bound, bound)
            b_ih = jax.random.uniform(k3, (4 * hidden,), jnp.float32, -bound, bound)
            b_hh = jax.random.uniform(k4, (4 * hidden,), jnp.float32, -bound, bound)
            wih_t.append(w_ih.T)                      # (din, 4H)
            whh_t.append(w_hh.T)                      # (H, 4H)
            bias.append((b_ih + b_hh).reshape(1, -1)) # (1, 4H)

        if layer == 0:
            # Single input stream; pad contraction rows to a sublane multiple.
            k_pad = -(-din // 8) * 8
            wih_f = jnp.pad(wih_t[0], ((0, k_pad - din), (0, 0)))[None]   # (1, Kp, 4H)
            wih_b = jnp.pad(wih_t[1], ((0, k_pad - din), (0, 0)))[None]
        else:
            # Two input streams (out_fwd, out_bwd): split W_ih rows per stream.
            wih_f = jnp.stack([wih_t[0][:hidden], wih_t[0][hidden:]], axis=0)  # (2, H, 4H)
            wih_b = jnp.stack([wih_t[1][:hidden], wih_t[1][hidden:]], axis=0)

        # Block-diagonal recurrent weight: [h_f | h_b] @ W_bd -> [gates_f | gates_b].
        whh_bd = jnp.zeros((2 * hidden, 8 * hidden), jnp.float32)
        whh_bd = whh_bd.at[:hidden, :4 * hidden].set(whh_t[0])
        whh_bd = whh_bd.at[hidden:, 4 * hidden:].set(whh_t[1])

        params.append({
            # Kernel layout (weights pre-cast to bf16 at the call boundary).
            "wih_f": wih_f.astype(jnp.bfloat16),
            "wih_b": wih_b.astype(jnp.bfloat16),
            "b_f": bias[0],
            "b_b": bias[1],
            "whh_bd": whh_bd.astype(jnp.bfloat16),
            # Reference (pure-JAX) layout, f32.
            "ref_wih_t": jnp.concatenate(wih_t, axis=1),     # (din, 8H)
            "ref_whh_t": jnp.stack(whh_t, axis=0),           # (2, H, 4H)
            "ref_b": jnp.concatenate(bias, axis=1),          # (1, 8H)
        })
    return params


# ---------------------------------------------------------------------------
# Pure-JAX reference (lax.scan) used only to validate the kernel numerics.
# Uses the same bf16-operand / f32-accumulation matmul recipe as the kernels.
# NOTE: the recurrent h is cast to bf16 each step (as in the kernel); this can
# drift from a pure-fp32 PyTorch LSTM over very long sequences.
# ---------------------------------------------------------------------------
def _bf16_dot(a, b):
    return jnp.dot(a.astype(jnp.bfloat16), b.astype(jnp.bfloat16),
                   preferred_element_type=jnp.float32)


def _ref_lstm_dir(x_seq, wih_t, whh_t, b, h0, c0, reverse):
    H = h0.shape[-1]
    xs = x_seq[::-1] if reverse else x_seq

    def step(carry, x_t):
        h, c = carry
        gates = _bf16_dot(x_t, wih_t) + _bf16_dot(h, whh_t) + b
        i = jax.nn.sigmoid(gates[:, :H])
        f = jax.nn.sigmoid(gates[:, H:2 * H])
        g = jnp.tanh(gates[:, 2 * H:3 * H])
        o = jax.nn.sigmoid(gates[:, 3 * H:])
        c_new = f * c + i * g
        h_new = o * jnp.tanh(c_new)
        return (h_new, c_new), h_new

    (hf, cf), hs = jax.lax.scan(step, (h0, c0), xs)
    if reverse:
        hs = hs[::-1]
    return hs, hf, cf


def _ref_forward(x, hidden, cell_state, params):
    layer_in = x
    h_fins, c_fins = [], []
    for layer in range(LAYERS_ENC):
        p = params[layer]
        H = p["ref_whh_t"].shape[1]
        G = 4 * H
        outs = []
        for d, rev in enumerate((False, True)):
            hs, hf, cf = _ref_lstm_dir(
                layer_in,
                p["ref_wih_t"][:, d * G:(d + 1) * G],
                p["ref_whh_t"][d],
                p["ref_b"][:, d * G:(d + 1) * G],
                hidden[2 * layer + d], cell_state[2 * layer + d], rev)
            outs.append(hs)
            h_fins.append(hf)
            c_fins.append(cf)
        layer_in = jnp.concatenate(outs, axis=-1)
    return layer_in, (jnp.stack(h_fins), jnp.stack(c_fins))


if __name__ == "__main__":
    # Small shapes consistent with the module: GloVe-dim (50) inputs into a
    # 2-layer bidirectional LSTM; zero-initialized hidden/cell (initHidden).
    T, B, INPUT_DIM, HIDDEN, TC = 16, 8, 50, 32, 4

    key = jax.random.PRNGKey(0)
    key, kx = jax.random.split(key)
    x = jax.random.normal(kx, (T, B, INPUT_DIM), jnp.float32)

    # BiEncoderRNN.initHidden(train=True) -> zeros of shape (2 * layers, B, H)
    hidden0 = jnp.zeros((2 * LAYERS_ENC, B, HIDDEN), jnp.float32)
    cell0 = jnp.zeros((2 * LAYERS_ENC, B, HIDDEN), jnp.float32)

    params = init_params(key, INPUT_DIM, HIDDEN)

    fwd = jax.jit(functools.partial(bi_encoder_rnn_forward, tc=TC))
    output_enc, (hidden_enc, cell_enc) = fwd(x, hidden0, cell0, params)
    jax.block_until_ready((output_enc, hidden_enc, cell_enc))

    # Validate against the pure-JAX reference.
    ref_out, (ref_h, ref_c) = _ref_forward(x, hidden0, cell0, params)
    np.testing.assert_allclose(np.asarray(output_enc), np.asarray(ref_out),
                               rtol=1e-3, atol=1e-3)
    np.testing.assert_allclose(np.asarray(hidden_enc), np.asarray(ref_h),
                               rtol=1e-3, atol=1e-3)
    np.testing.assert_allclose(np.asarray(cell_enc), np.asarray(ref_c),
                               rtol=1e-3, atol=1e-3)

    assert output_enc.shape == (T, B, 2 * HIDDEN)
    assert hidden_enc.shape == (2 * LAYERS_ENC, B, HIDDEN)
    assert cell_enc.shape == (2 * LAYERS_ENC, B, HIDDEN)

    print("KERNEL_OK")
</pallas_src>

<mosaic_0001>
module attributes {stable_mosaic.version = 11 : i64} {
  func.func @_input_proj_kernel(%arg0: i32, %arg1: memref<128x56xf32, #tpu.memory_space<vmem>>, %arg2: memref<1x56x128xbf16, #tpu.memory_space<vmem>>, %arg3: memref<1x56x128xbf16, #tpu.memory_space<vmem>>, %arg4: memref<1x128xf32, #tpu.memory_space<vmem>>, %arg5: memref<1x128xf32, #tpu.memory_space<vmem>>, %arg6: memref<128x128xf32, #tpu.memory_space<vmem>>, %arg7: memref<128x128xf32, #tpu.memory_space<vmem>>) attributes {dimension_semantics = [#tpu.dimension_semantics<parallel>], iteration_bounds = array<i64: 1>, scalar_prefetch = 0 : i64, scratch_operands = 0 : i64, tpu.core_type = #tpu.core_type<tc>, window_params = [{transform_indices = @transform_0, window_bounds = array<i64: 128, 56>}, {pipeline_mode = #tpu.pipeline_mode<synchronous>, transform_indices = @transform_1, window_bounds = array<i64: 1, 56, 128>}, {pipeline_mode = #tpu.pipeline_mode<synchronous>, transform_indices = @transform_2, window_bounds = array<i64: 1, 56, 128>}, {pipeline_mode = #tpu.pipeline_mode<synchronous>, transform_indices = @transform_3, window_bounds = array<i64: 1, 128>}, {pipeline_mode = #tpu.pipeline_mode<synchronous>, transform_indices = @transform_4, window_bounds = array<i64: 1, 128>}, {transform_indices = @transform_5, window_bounds = array<i64: 128, 128>}, {transform_indices = @transform_6, window_bounds = array<i64: 128, 128>}]} {
    %c0 = arith.constant 0 : index
    %c0_0 = arith.constant 0 : index
    %0 = vector.load %arg4[%c0, %c0_0] : memref<1x128xf32, #tpu.memory_space<vmem>>, vector<1x128xf32>
    %c0_1 = arith.constant 0 : index
    %c0_2 = arith.constant 0 : index
    %1 = vector.load %arg5[%c0_1, %c0_2] : memref<1x128xf32, #tpu.memory_space<vmem>>, vector<1x128xf32>
    %c0_3 = arith.constant 0 : index
    %c0_4 = arith.constant 0 : index
    %2 = vector.load %arg1[%c0_3, %c0_4] : memref<128x56xf32, #tpu.memory_space<vmem>>, vector<128x56xf32>
    %3 = arith.truncf %2 : vector<128x56xf32> to vector<128x56xbf16>
    %c0_5 = arith.constant 0 : index
    %c0_6 = arith.constant 0 : index
    %c0_7 = arith.constant 0 : index
    %4 = vector.load %arg2[%c0_5, %c0_6, %c0_7] : memref<1x56x128xbf16, #tpu.memory_space<vmem>>, vector<1x56x128xbf16>
    %5 = vector.shape_cast %4 : vector<1x56x128xbf16> to vector<56x128xbf16>
    %cst = arith.constant dense<0.000000e+00> : vector<128x128xf32>
    %6 = tpu.matmul %3, %5, %cst {dimension_numbers = #tpu.dot_dimension_numbers<[1], [0], [0], [1], [0, 0, 1, 1], [], []>} : vector<128x56xbf16>, vector<56x128xbf16>, vector<128x128xf32> -> vector<128x128xf32>
    %7 = vector.broadcast %0 : vector<1x128xf32> to vector<128x128xf32>
    %8 = arith.addf %7, %6 : vector<128x128xf32>
    %c0_8 = arith.constant 0 : index
    %c0_9 = arith.constant 0 : index
    %c0_10 = arith.constant 0 : index
    %9 = vector.load %arg3[%c0_8, %c0_9, %c0_10] : memref<1x56x128xbf16, #tpu.memory_space<vmem>>, vector<1x56x128xbf16>
    %10 = vector.shape_cast %9 : vector<1x56x128xbf16> to vector<56x128xbf16>
    %cst_11 = arith.constant dense<0.000000e+00> : vector<128x128xf32>
    %11 = tpu.matmul %3, %10, %cst_11 {dimension_numbers = #tpu.dot_dimension_numbers<[1], [0], [0], [1], [0, 0, 1, 1], [], []>} : vector<128x56xbf16>, vector<56x128xbf16>, vector<128x128xf32> -> vector<128x128xf32>
    %12 = vector.broadcast %1 : vector<1x128xf32> to vector<128x128xf32>
    %13 = arith.addf %12, %11 : vector<128x128xf32>
    %c0_12 = arith.constant 0 : index
    %c0_13 = arith.constant 0 : index
    %14 = vector.load %arg6[%c0_12, %c0_13] : memref<128x128xf32, #tpu.memory_space<vmem>>, vector<128x128xf32>
    tpu.vector_store %arg6[%c0_12, %c0_13], %8 {strides = array<i32>} : memref<128x128xf32, #tpu.memory_space<vmem>>, vector<128x128xf32>,
    %c0_14 = arith.constant 0 : index
    %c0_15 = arith.constant 0 : index
    %15 = vector.load %arg7[%c0_14, %c0_15] : memref<128x128xf32, #tpu.memory_space<vmem>>, vector<128x128xf32>
    tpu.vector_store %arg7[%c0_14, %c0_15], %13 {strides = array<i32>} : memref<128x128xf32, #tpu.memory_space<vmem>>, vector<128x128xf32>,
    return
  }
  func.func @transform_0(%arg0: i32) -> (i32, i32) {
    %c0_i32 = arith.constant 0 : i32
    %c0_i32_0 = arith.constant 0 : i32
    return %arg0, %c0_i32 : i32, i32
  }
  func.func @transform_1(%arg0: i32) -> (i32, i32, i32) {
    %c0_i32 = arith.constant 0 : i32
    %c0_i32_0 = arith.constant 0 : i32
    %c0_i32_1 = arith.constant 0 : i32
    %c0_i32_2 = arith.constant 0 : i32
    return %c0_i32, %c0_i32_0, %c0_i32_1 : i32, i32, i32
  }
  func.func @transform_2(%arg0: i32) -> (i32, i32, i32) {
    %c0_i32 = arith.constant 0 : i32
    %c0_i32_0 = arith.constant 0 : i32
    %c0_i32_1 = arith.constant 0 : i32
    %c0_i32_2 = arith.constant 0 : i32
    return %c0_i32, %c0_i32_0, %c0_i32_1 : i32, i32, i32
  }
  func.func @transform_3(%arg0: i32) -> (i32, i32) {
    %c0_i32 = arith.constant 0 : i32
    %c0_i32_0 = arith.constant 0 : i32
    %c0_i32_1 = arith.constant 0 : i32
    return %c0_i32, %c0_i32_0 : i32, i32
  }
  func.func @transform_4(%arg0: i32) -> (i32, i32) {
    %c0_i32 = arith.constant 0 : i32
    %c0_i32_0 = arith.constant 0 : i32
    %c0_i32_1 = arith.constant 0 : i32
    return %c0_i32, %c0_i32_0 : i32, i32
  }
  func.func @transform_5(%arg0: i32) -> (i32, i32) {
    %c0_i32 = arith.constant 0 : i32
    %c0_i32_0 = arith.constant 0 : i32
    return %arg0, %c0_i32 : i32, i32
  }
  func.func @transform_6(%arg0: i32) -> (i32, i32) {
    %c0_i32 = arith.constant 0 : i32
    %c0_i32_0 = arith.constant 0 : i32
    return %arg0, %c0_i32 : i32, i32
  }
}

module attributes {stable_mosaic.version = 11 : i64} {
  func.func @_input_proj_kernel(%arg0: i32, %arg1: memref<128x32xf32, #tpu.memory_space<vmem>>, %arg2: memref<128x32xf32, #tpu.memory_space<vmem>>, %arg3: memref<2x32x128xbf16, #tpu.memory_space<vmem>>, %arg4: memref<2x32x128xbf16, #tpu.memory_space<vmem>>, %arg5: memref<1x128xf32, #tpu.memory_space<vmem>>, %arg6: memref<1x128xf32, #tpu.memory_space<vmem>>, %arg7: memref<128x128xf32, #tpu.memory_space<vmem>>, %arg8: memref<128x128xf32, #tpu.memory_space<vmem>>) attributes {dimension_semantics = [#tpu.dimension_semantics<parallel>], iteration_bounds = array<i64: 1>, scalar_prefetch = 0 : i64, scratch_operands = 0 : i64, tpu.core_type = #tpu.core_type<tc>, window_params = [{transform_indices = @transform_0, window_bounds = array<i64: 128, 32>}, {transform_indices = @transform_1, window_bounds = array<i64: 128, 32>}, {pipeline_mode = #tpu.pipeline_mode<synchronous>, transform_indices = @transform_2, window_bounds = array<i64: 2, 32, 128>}, {pipeline_mode = #tpu.pipeline_mode<synchronous>, transform_indices = @transform_3, window_bounds = array<i64: 2, 32, 128>}, {pipeline_mode = #tpu.pipeline_mode<synchronous>, transform_indices = @transform_4, window_bounds = array<i64: 1, 128>}, {pipeline_mode = #tpu.pipeline_mode<synchronous>, transform_indices = @transform_5, window_bounds = array<i64: 1, 128>}, {transform_indices = @transform_6, window_bounds = array<i64: 128, 128>}, {transform_indices = @transform_7, window_bounds = array<i64: 128, 128>}]} {
    %c0 = arith.constant 0 : index
    %c0_0 = arith.constant 0 : index
    %0 = vector.load %arg5[%c0, %c0_0] : memref<1x128xf32, #tpu.memory_space<vmem>>, vector<1x128xf32>
    %c0_1 = arith.constant 0 : index
    %c0_2 = arith.constant 0 : index
    %1 = vector.load %arg6[%c0_1, %c0_2] : memref<1x128xf32, #tpu.memory_space<vmem>>, vector<1x128xf32>
    %c0_3 = arith.constant 0 : index
    %c0_4 = arith.constant 0 : index
    %2 = vector.load %arg1[%c0_3, %c0_4] : memref<128x32xf32, #tpu.memory_space<vmem>>, vector<128x32xf32>
    %3 = arith.truncf %2 : vector<128x32xf32> to vector<128x32xbf16>
    %c0_5 = arith.constant 0 : index
    %c0_6 = arith.constant 0 : index
    %c0_7 = arith.constant 0 : index
    %4 = vector.load %arg3[%c0_5, %c0_6, %c0_7] : memref<2x32x128xbf16, #tpu.memory_space<vmem>>, vector<1x32x128xbf16>
    %5 = vector.shape_cast %4 : vector<1x32x128xbf16> to vector<32x128xbf16>
    %cst = arith.constant dense<0.000000e+00> : vector<128x128xf32>
    %6 = tpu.matmul %3, %5, %cst {dimension_numbers = #tpu.dot_dimension_numbers<[1], [0], [0], [1], [0, 0, 1, 1], [], []>} : vector<128x32xbf16>, vector<32x128xbf16>, vector<128x128xf32> -> vector<128x128xf32>
    %7 = vector.broadcast %0 : vector<1x128xf32> to vector<128x128xf32>
    %8 = arith.addf %7, %6 : vector<128x128xf32>
    %c0_8 = arith.constant 0 : index
    %c0_9 = arith.constant 0 : index
    %c0_10 = arith.constant 0 : index
    %9 = vector.load %arg4[%c0_8, %c0_9, %c0_10] : memref<2x32x128xbf16, #tpu.memory_space<vmem>>, vector<1x32x128xbf16>
    %10 = vector.shape_cast %9 : vector<1x32x128xbf16> to vector<32x128xbf16>
    %cst_11 = arith.constant dense<0.000000e+00> : vector<128x128xf32>
    %11 = tpu.matmul %3, %10, %cst_11 {dimension_numbers = #tpu.dot_dimension_numbers<[1], [0], [0], [1], [0, 0, 1, 1], [], []>} : vector<128x32xbf16>, vector<32x128xbf16>, vector<128x128xf32> -> vector<128x128xf32>
    %12 = vector.broadcast %1 : vector<1x128xf32> to vector<128x128xf32>
    %13 = arith.addf %12, %11 : vector<128x128xf32>
    %c0_12 = arith.constant 0 : index
    %c0_13 = arith.constant 0 : index
    %14 = vector.load %arg2[%c0_12, %c0_13] : memref<128x32xf32, #tpu.memory_space<vmem>>, vector<128x32xf32>
    %15 = arith.truncf %14 : vector<128x32xf32> to vector<128x32xbf16>
    %c1 = arith.constant 1 : index
    %c0_14 = arith.constant 0 : index
    %c0_15 = arith.constant 0 : index
    %16 = vector.load %arg3[%c1, %c0_14, %c0_15] : memref<2x32x128xbf16, #tpu.memory_space<vmem>>, vector<1x32x128xbf16>
    %17 = vector.shape_cast %16 : vector<1x32x128xbf16> to vector<32x128xbf16>
    %cst_16 = arith.constant dense<0.000000e+00> : vector<128x128xf32>
    %18 = tpu.matmul %15, %17, %cst_16 {dimension_numbers = #tpu.dot_dimension_numbers<[1], [0], [0], [1], [0, 0, 1, 1], [], []>} : vector<128x32xbf16>, vector<32x128xbf16>, vector<128x128xf32> -> vector<128x128xf32>
    %19 = arith.addf %8, %18 : vector<128x128xf32>
    %c1_17 = arith.constant 1 : index
    %c0_18 = arith.constant 0 : index
    %c0_19 = arith.constant 0 : index
    %20 = vector.load %arg4[%c1_17, %c0_18, %c0_19] : memref<2x32x128xbf16, #tpu.memory_space<vmem>>, vector<1x32x128xbf16>
    %21 = vector.shape_cast %20 : vector<1x32x128xbf16> to vector<32x128xbf16>
    %cst_20 = arith.constant dense<0.000000e+00> : vector<128x128xf32>
    %22 = tpu.matmul %15, %21, %cst_20 {dimension_numbers = #tpu.dot_dimension_numbers<[1], [0], [0], [1], [0, 0, 1, 1], [], []>} : vector<128x32xbf16>, vector<32x128xbf16>, vector<128x128xf32> -> vector<128x128xf32>
    %23 = arith.addf %13, %22 : vector<128x128xf32>
    %c0_21 = arith.constant 0 : index
    %c0_22 = arith.constant 0 : index
    %24 = vector.load %arg7[%c0_21, %c0_22] : memref<128x128xf32, #tpu.memory_space<vmem>>, vector<128x128xf32>
    tpu.vector_store %arg7[%c0_21, %c0_22], %19 {strides = array<i32>} : memref<128x128xf32, #tpu.memory_space<vmem>>, vector<128x128xf32>,
    %c0_23 = arith.constant 0 : index
    %c0_24 = arith.constant 0 : index
    %25 = vector.load %arg8[%c0_23, %c0_24] : memref<128x128xf32, #tpu.memory_space<vmem>>, vector<128x128xf32>
    tpu.vector_store %arg8[%c0_23, %c0_24], %23 {strides = array<i32>} : memref<128x128xf32, #tpu.memory_space<vmem>>, vector<128x128xf32>,
    return
  }
  func.func @transform_0(%arg0: i32) -> (i32, i32) {
    %c0_i32 = arith.constant 0 : i32
    %c0_i32_0 = arith.constant 0 : i32
    return %arg0, %c0_i32 : i32, i32
  }
  func.func @transform_1(%arg0: i32) -> (i32, i32) {
    %c0_i32 = arith.constant 0 : i32
    %c0_i32_0 = arith.constant 0 : i32
    return %arg0, %c0_i32 : i32, i32
  }
  func.func @transform_2(%arg0: i32) -> (i32, i32, i32) {
    %c0_i32 = arith.constant 0 : i32
    %c0_i32_0 = arith.constant 0 : i32
    %c0_i32_1 = arith.constant 0 : i32
    %c0_i32_2 = arith.constant 0 : i32
    return %c0_i32, %c0_i32_0, %c0_i32_1 : i32, i32, i32
  }
  func.func @transform_3(%arg0: i32) -> (i32, i32, i32) {
    %c0_i32 = arith.constant 0 : i32
    %c0_i32_0 = arith.constant 0 : i32
    %c0_i32_1 = arith.constant 0 : i32
    %c0_i32_2 = arith.constant 0 : i32
    return %c0_i32, %c0_i32_0, %c0_i32_1 : i32, i32, i32
  }
  func.func @transform_4(%arg0: i32) -> (i32, i32) {
    %c0_i32 = arith.constant 0 : i32
    %c0_i32_0 = arith.constant 0 : i32
    %c0_i32_1 = arith.constant 0 : i32
    return %c0_i32, %c0_i32_0 : i32, i32
  }
  func.func @transform_5(%arg0: i32) -> (i32, i32) {
    %c0_i32 = arith.constant 0 : i32
    %c0_i32_0 = arith.constant 0 : i32
    %c0_i32_1 = arith.constant 0 : i32
    return %c0_i32, %c0_i32_0 : i32, i32
  }
  func.func @transform_6(%arg0: i32) -> (i32, i32) {
    %c0_i32 = arith.constant 0 : i32
    %c0_i32_0 = arith.constant 0 : i32
    return %arg0, %c0_i32 : i32, i32
  }
  func.func @transform_7(%arg0: i32) -> (i32, i32) {
    %c0_i32 = arith.constant 0 : i32
    %c0_i32_0 = arith.constant 0 : i32
    return %arg0, %c0_i32 : i32, i32
  }
}

module attributes {stable_mosaic.version = 11 : i64} {
  func.func @_bilstm_layer_kernel(%arg0: i32, %arg1: memref<4x8x128xf32, #tpu.memory_space<vmem>>, %arg2: memref<4x8x128xf32, #tpu.memory_space<vmem>>, %arg3: memref<64x256xbf16, #tpu.memory_space<vmem>>, %arg4: memref<8x64xf32, #tpu.memory_space<vmem>>, %arg5: memref<2x8x32xf32, #tpu.memory_space<vmem>>, %arg6: memref<4x8x32xf32, #tpu.memory_space<vmem>>, %arg7: memref<4x8x32xf32, #tpu.memory_space<vmem>>, %arg8: memref<2x8x32xf32, #tpu.memory_space<vmem>>, %arg9: memref<2x8x32xf32, #tpu.memory_space<vmem>>, %arg10: memref<8x64xf32, #tpu.memory_space<vmem>>, %arg11: memref<2x8x32xf32, #tpu.memory_space<vmem>>) attributes {dimension_semantics = [#tpu.dimension_semantics<arbitrary>], iteration_bounds = array<i64: 4>, scalar_prefetch = 0 : i64, scratch_operands = 2 : i64, tpu.core_type = #tpu.core_type<tc>, window_params = [{transform_indices = @transform_0, window_bounds = array<i64: 4, 8, 128>}, {transform_indices = @transform_1, window_bounds = array<i64: 4, 8, 128>}, {pipeline_mode = #tpu.pipeline_mode<synchronous>, transform_indices = @transform_2, window_bounds = array<i64: 64, 256>}, {pipeline_mode = #tpu.pipeline_mode<synchronous>, transform_indices = @transform_3, window_bounds = array<i64: 8, 64>}, {pipeline_mode = #tpu.pipeline_mode<synchronous>, transform_indices = @transform_4, window_bounds = array<i64: 2, 8, 32>}, {transform_indices = @transform_5, window_bounds = array<i64: 4, 8, 32>}, {transform_indices = @transform_6, window_bounds = array<i64: 4, 8, 32>}, {pipeline_mode = #tpu.pipeline_mode<synchronous>, transform_indices = @transform_7, window_bounds = array<i64: 2, 8, 32>}, {pipeline_mode = #tpu.pipeline_mode<synchronous>, transform_indices = @transform_8, window_bounds = array<i64: 2, 8, 32>}]} {
    %c0_i32 = arith.constant 0 : i32
    %0 = arith.cmpi eq, %arg0, %c0_i32 : i32
    %1 = arith.extui %0 : i1 to i32
    %c0_i32_0 = arith.constant 0 : i32
    %2 = arith.cmpi ne, %1, %c0_i32_0 : i32
    scf.if %2 {
      %c0_75 = arith.constant 0 : index
      %c0_76 = arith.constant 0 : index
      %207 = vector.load %arg4[%c0_75, %c0_76] : memref<8x64xf32, #tpu.memory_space<vmem>>, vector<8x64xf32>
      %c0_77 = arith.constant 0 : index
      %c0_78 = arith.constant 0 : index
      %208 = vector.load %arg10[%c0_77, %c0_78] : memref<8x64xf32, #tpu.memory_space<vmem>>, vector<8x64xf32>
      tpu.vector_store %arg10[%c0_77, %c0_78], %207 {strides = array<i32>} : memref<8x64xf32, #tpu.memory_space<vmem>>, vector<8x64xf32>,
      %c0_79 = arith.constant 0 : index
      %c0_80 = arith.constant 0 : index
      %c0_81 = arith.constant 0 : index
      %209 = vector.load %arg5[%c0_79, %c0_80, %c0_81] : memref<2x8x32xf32, #tpu.memory_space<vmem>>, vector<2x8x32xf32>
      %c0_82 = arith.constant 0 : index
      %c0_83 = arith.constant 0 : index
      %c0_84 = arith.constant 0 : index
      %210 = vector.load %arg11[%c0_82, %c0_83, %c0_84] : memref<2x8x32xf32, #tpu.memory_space<vmem>>, vector<2x8x32xf32>
      tpu.vector_store %arg11[%c0_82, %c0_83, %c0_84], %209 {strides = array<i32>} : memref<2x8x32xf32, #tpu.memory_space<vmem>>, vector<2x8x32xf32>,
    } else {
    }
    %c0 = arith.constant 0 : index
    %c0_1 = arith.constant 0 : index
    %3 = vector.load %arg3[%c0, %c0_1] : memref<64x256xbf16, #tpu.memory_space<vmem>>, vector<64x256xbf16>
    %c0_2 = arith.constant 0 : index
    %c0_3 = arith.constant 0 : index
    %4 = vector.load %arg10[%c0_2, %c0_3] : memref<8x64xf32, #tpu.memory_space<vmem>>, vector<8x64xf32>
    %c0_4 = arith.constant 0 : index
    %c0_5 = arith.constant 0 : index
    %c0_6 = arith.constant 0 : index
    %5 = vector.load %arg11[%c0_4, %c0_5, %c0_6] : memref<2x8x32xf32, #tpu.memory_space<vmem>>, vector<1x8x32xf32>
    %6 = vector.shape_cast %5 : vector<1x8x32xf32> to vector<8x32xf32>
    %c1 = arith.constant 1 : index
    %c0_7 = arith.constant 0 : index
    %c0_8 = arith.constant 0 : index
    %7 = vector.load %arg11[%c1, %c0_7, %c0_8] : memref<2x8x32xf32, #tpu.memory_space<vmem>>, vector<1x8x32xf32>
    %8 = vector.shape_cast %7 : vector<1x8x32xf32> to vector<8x32xf32>
    %9 = arith.truncf %4 : vector<8x64xf32> to vector<8x64xbf16>
    %cst = arith.constant dense<0.000000e+00> : vector<8x256xf32>
    %10 = tpu.matmul %9, %3, %cst {dimension_numbers = #tpu.dot_dimension_numbers<[1], [0], [0], [1], [0, 0, 1, 1], [], []>} : vector<8x64xbf16>, vector<64x256xbf16>, vector<8x256xf32> -> vector<8x256xf32>
    %c0_9 = arith.constant 0 : index
    %c0_10 = arith.constant 0 : index
    %c0_11 = arith.constant 0 : index
    %11 = vector.load %arg1[%c0_9, %c0_10, %c0_11] : memref<4x8x128xf32, #tpu.memory_space<vmem>>, vector<1x8x128xf32>
    %12 = vector.shape_cast %11 : vector<1x8x128xf32> to vector<8x128xf32>
    %13 = vector.extract_strided_slice %10 {offsets = [0, 0], sizes = [8, 128], strides = [1, 1]} : vector<8x256xf32> to vector<8x128xf32>
    %14 = arith.addf %12, %13 : vector<8x128xf32>
    %c3 = arith.constant 3 : index
    %c0_12 = arith.constant 0 : index
    %c0_13 = arith.constant 0 : index
    %15 = vector.load %arg2[%c3, %c0_12, %c0_13] : memref<4x8x128xf32, #tpu.memory_space<vmem>>, vector<1x8x128xf32>
    %16 = vector.shape_cast %15 : vector<1x8x128xf32> to vector<8x128xf32>
    %17 = vector.extract_strided_slice %10 {offsets = [0, 128], sizes = [8, 128], strides = [1, 1]} : vector<8x256xf32> to vector<8x128xf32>
    %18 = arith.addf %16, %17 : vector<8x128xf32>
    %19 = arith.negf %14 : vector<8x128xf32>
    %20 = math.exp %19 : vector<8x128xf32>
    %cst_14 = arith.constant 1.000000e+00 : f32
    %21 = vector.broadcast %cst_14 : f32 to vector<8x128xf32>
    %22 = arith.addf %21, %20 : vector<8x128xf32>
    %23 = arith.divf %21, %22 : vector<8x128xf32>
    %24 = math.tanh %14 : vector<8x128xf32>
    %25 = vector.extract_strided_slice %23 {offsets = [0, 0], sizes = [8, 32], strides = [1, 1]} : vector<8x128xf32> to vector<8x32xf32>
    %26 = vector.extract_strided_slice %23 {offsets = [0, 32], sizes = [8, 32], strides = [1, 1]} : vector<8x128xf32> to vector<8x32xf32>
    %27 = vector.extract_strided_slice %23 {offsets = [0, 96], sizes = [8, 32], strides = [1, 1]} : vector<8x128xf32> to vector<8x32xf32>
    %28 = vector.extract_strided_slice %24 {offsets = [0, 64], sizes = [8, 32], strides = [1, 1]} : vector<8x128xf32> to vector<8x32xf32>
    %29 = arith.mulf %26, %6 : vector<8x32xf32>
    %30 = arith.mulf %25, %28 : vector<8x32xf32>
    %31 = arith.addf %29, %30 : vector<8x32xf32>
    %32 = math.tanh %31 : vector<8x32xf32>
    %33 = arith.mulf %27, %32 : vector<8x32xf32>
    %34 = arith.negf %18 : vector<8x128xf32>
    %35 = math.exp %34 : vector<8x128xf32>
    %cst_15 = arith.constant 1.000000e+00 : f32
    %36 = vector.broadcast %cst_15 : f32 to vector<8x128xf32>
    %37 = arith.addf %36, %35 : vector<8x128xf32>
    %38 = arith.divf %36, %37 : vector<8x128xf32>
    %39 = math.tanh %18 : vector<8x128xf32>
    %40 = vector.extract_strided_slice %38 {offsets = [0, 0], sizes = [8, 32], strides = [1, 1]} : vector<8x128xf32> to vector<8x32xf32>
    %41 = vector.extract_strided_slice %38 {offsets = [0, 32], sizes = [8, 32], strides = [1, 1]} : vector<8x128xf32> to vector<8x32xf32>
    %42 = vector.extract_strided_slice %38 {offsets = [0, 96], sizes = [8, 32], strides = [1, 1]} : vector<8x128xf32> to vector<8x32xf32>
    %43 = vector.extract_strided_slice %39 {offsets = [0, 64], sizes = [8, 32], strides = [1, 1]} : vector<8x128xf32> to vector<8x32xf32>
    %44 = arith.mulf %41, %8 : vector<8x32xf32>
    %45 = arith.mulf %40, %43 : vector<8x32xf32>
    %46 = arith.addf %44, %45 : vector<8x32xf32>
    %47 = math.tanh %46 : vector<8x32xf32>
    %48 = arith.mulf %42, %47 : vector<8x32xf32>
    %c0_16 = arith.constant 0 : index
    %c0_17 = arith.constant 0 : index
    %c0_18 = arith.constant 0 : index
    %49 = vector.load %arg6[%c0_16, %c0_17, %c0_18] : memref<4x8x32xf32, #tpu.memory_space<vmem>>, vector<1x8x32xf32>
    %50 = vector.shape_cast %49 : vector<1x8x32xf32> to vector<8x32xf32>
    %51 = vector.shape_cast %33 : vector<8x32xf32> to vector<1x8x32xf32>
    tpu.vector_store %arg6[%c0_16, %c0_17, %c0_18], %51 {strides = array<i32>} : memref<4x8x32xf32, #tpu.memory_space<vmem>>, vector<1x8x32xf32>,
    %c3_19 = arith.constant 3 : index
    %c0_20 = arith.constant 0 : index
    %c0_21 = arith.constant 0 : index
    %52 = vector.load %arg7[%c3_19, %c0_20, %c0_21] : memref<4x8x32xf32, #tpu.memory_space<vmem>>, vector<1x8x32xf32>
    %53 = vector.shape_cast %52 : vector<1x8x32xf32> to vector<8x32xf32>
    %54 = vector.shape_cast %48 : vector<8x32xf32> to vector<1x8x32xf32>
    tpu.vector_store %arg7[%c3_19, %c0_20, %c0_21], %54 {strides = array<i32>} : memref<4x8x32xf32, #tpu.memory_space<vmem>>, vector<1x8x32xf32>,
    %55 = tpu.concatenate %33, %48 in 1 : vector<8x32xf32>, vector<8x32xf32> -> vector<8x64xf32>
    %56 = arith.truncf %55 : vector<8x64xf32> to vector<8x64xbf16>
    %cst_22 = arith.constant dense<0.000000e+00> : vector<8x256xf32>
    %57 = tpu.matmul %56, %3, %cst_22 {dimension_numbers = #tpu.dot_dimension_numbers<[1], [0], [0], [1], [0, 0, 1, 1], [], []>} : vector<8x64xbf16>, vector<64x256xbf16>, vector<8x256xf32> -> vector<8x256xf32>
    %c1_23 = arith.constant 1 : index
    %c0_24 = arith.constant 0 : index
    %c0_25 = arith.constant 0 : index
    %58 = vector.load %arg1[%c1_23, %c0_24, %c0_25] : memref<4x8x128xf32, #tpu.memory_space<vmem>>, vector<1x8x128xf32>
    %59 = vector.shape_cast %58 : vector<1x8x128xf32> to vector<8x128xf32>
    %60 = vector.extract_strided_slice %57 {offsets = [0, 0], sizes = [8, 128], strides = [1, 1]} : vector<8x256xf32> to vector<8x128xf32>
    %61 = arith.addf %59, %60 : vector<8x128xf32>
    %c2 = arith.constant 2 : index
    %c0_26 = arith.constant 0 : index
    %c0_27 = arith.constant 0 : index
    %62 = vector.load %arg2[%c2, %c0_26, %c0_27] : memref<4x8x128xf32, #tpu.memory_space<vmem>>, vector<1x8x128xf32>
    %63 = vector.shape_cast %62 : vector<1x8x128xf32> to vector<8x128xf32>
    %64 = vector.extract_strided_slice %57 {offsets = [0, 128], sizes = [8, 128], strides = [1, 1]} : vector<8x256xf32> to vector<8x128xf32>
    %65 = arith.addf %63, %64 : vector<8x128xf32>
    %66 = arith.negf %61 : vector<8x128xf32>
    %67 = math.exp %66 : vector<8x128xf32>
    %cst_28 = arith.constant 1.000000e+00 : f32
    %68 = vector.broadcast %cst_28 : f32 to vector<8x128xf32>
    %69 = arith.addf %68, %67 : vector<8x128xf32>
    %70 = arith.divf %68, %69 : vector<8x128xf32>
    %71 = math.tanh %61 : vector<8x128xf32>
    %72 = vector.extract_strided_slice %70 {offsets = [0, 0], sizes = [8, 32], strides = [1, 1]} : vector<8x128xf32> to vector<8x32xf32>
    %73 = vector.extract_strided_slice %70 {offsets = [0, 32], sizes = [8, 32], strides = [1, 1]} : vector<8x128xf32> to vector<8x32xf32>
    %74 = vector.extract_strided_slice %70 {offsets = [0, 96], sizes = [8, 32], strides = [1, 1]} : vector<8x128xf32> to vector<8x32xf32>
    %75 = vector.extract_strided_slice %71 {offsets = [0, 64], sizes = [8, 32], strides = [1, 1]} : vector<8x128xf32> to vector<8x32xf32>
    %76 = arith.mulf %73, %31 : vector<8x32xf32>
    %77 = arith.mulf %72, %75 : vector<8x32xf32>
    %78 = arith.addf %76, %77 : vector<8x32xf32>
    %79 = math.tanh %78 : vector<8x32xf32>
    %80 = arith.mulf %74, %79 : vector<8x32xf32>
    %81 = arith.negf %65 : vector<8x128xf32>
    %82 = math.exp %81 : vector<8x128xf32>
    %cst_29 = arith.constant 1.000000e+00 : f32
    %83 = vector.broadcast %cst_29 : f32 to vector<8x128xf32>
    %84 = arith.addf %83, %82 : vector<8x128xf32>
    %85 = arith.divf %83, %84 : vector<8x128xf32>
    %86 = math.tanh %65 : vector<8x128xf32>
    %87 = vector.extract_strided_slice %85 {offsets = [0, 0], sizes = [8, 32], strides = [1, 1]} : vector<8x128xf32> to vector<8x32xf32>
    %88 = vector.extract_strided_slice %85 {offsets = [0, 32], sizes = [8, 32], strides = [1, 1]} : vector<8x128xf32> to vector<8x32xf32>
    %89 = vector.extract_strided_slice %85 {offsets = [0, 96], sizes = [8, 32], strides = [1, 1]} : vector<8x128xf32> to vector<8x32xf32>
    %90 = vector.extract_strided_slice %86 {offsets = [0, 64], sizes = [8, 32], strides = [1, 1]} : vector<8x128xf32> to vector<8x32xf32>
    %91 = arith.mulf %88, %46 : vector<8x32xf32>
    %92 = arith.mulf %87, %90 : vector<8x32xf32>
    %93 = arith.addf %91, %92 : vector<8x32xf32>
    %94 = math.tanh %93 : vector<8x32xf32>
    %95 = arith.mulf %89, %94 : vector<8x32xf32>
    %c1_30 = arith.constant 1 : index
    %c0_31 = arith.constant 0 : index
    %c0_32 = arith.constant 0 : index
    %96 = vector.load %arg6[%c1_30, %c0_31, %c0_32] : memref<4x8x32xf32, #tpu.memory_space<vmem>>, vector<1x8x32xf32>
    %97 = vector.shape_cast %96 : vector<1x8x32xf32> to vector<8x32xf32>
    %98 = vector.shape_cast %80 : vector<8x32xf32> to vector<1x8x32xf32>
    tpu.vector_store %arg6[%c1_30, %c0_31, %c0_32], %98 {strides = array<i32>} : memref<4x8x32xf32, #tpu.memory_space<vmem>>, vector<1x8x32xf32>,
    %c2_33 = arith.constant 2 : index
    %c0_34 = arith.constant 0 : index
    %c0_35 = arith.constant 0 : index
    %99 = vector.load %arg7[%c2_33, %c0_34, %c0_35] : memref<4x8x32xf32, #tpu.memory_space<vmem>>, vector<1x8x32xf32>
    %100 = vector.shape_cast %99 : vector<1x8x32xf32> to vector<8x32xf32>
    %101 = vector.shape_cast %95 : vector<8x32xf32> to vector<1x8x32xf32>
    tpu.vector_store %arg7[%c2_33, %c0_34, %c0_35], %101 {strides = array<i32>} : memref<4x8x32xf32, #tpu.memory_space<vmem>>, vector<1x8x32xf32>,
    %102 = tpu.concatenate %80, %95 in 1 : vector<8x32xf32>, vector<8x32xf32> -> vector<8x64xf32>
    %103 = arith.truncf %102 : vector<8x64xf32> to vector<8x64xbf16>
    %cst_36 = arith.constant dense<0.000000e+00> : vector<8x256xf32>
    %104 = tpu.matmul %103, %3, %cst_36 {dimension_numbers = #tpu.dot_dimension_numbers<[1], [0], [0], [1], [0, 0, 1, 1], [], []>} : vector<8x64xbf16>, vector<64x256xbf16>, vector<8x256xf32> -> vector<8x256xf32>
    %c2_37 = arith.constant 2 : index
    %c0_38 = arith.constant 0 : index
    %c0_39 = arith.constant 0 : index
    %105 = vector.load %arg1[%c2_37, %c0_38, %c0_39] : memref<4x8x128xf32, #tpu.memory_space<vmem>>, vector<1x8x128xf32>
    %106 = vector.shape_cast %105 : vector<1x8x128xf32> to vector<8x128xf32>
    %107 = vector.extract_strided_slice %104 {offsets = [0, 0], sizes = [8, 128], strides = [1, 1]} : vector<8x256xf32> to vector<8x128xf32>
    %108 = arith.addf %106, %107 : vector<8x128xf32>
    %c1_40 = arith.constant 1 : index
    %c0_41 = arith.constant 0 : index
    %c0_42 = arith.constant 0 : index
    %109 = vector.load %arg2[%c1_40, %c0_41, %c0_42] : memref<4x8x128xf32, #tpu.memory_space<vmem>>, vector<1x8x128xf32>
    %110 = vector.shape_cast %109 : vector<1x8x128xf32> to vector<8x128xf32>
    %111 = vector.extract_strided_slice %104 {offsets = [0, 128], sizes = [8, 128], strides = [1, 1]} : vector<8x256xf32> to vector<8x128xf32>
    %112 = arith.addf %110, %111 : vector<8x128xf32>
    %113 = arith.negf %108 : vector<8x128xf32>
    %114 = math.exp %113 : vector<8x128xf32>
    %cst_43 = arith.constant 1.000000e+00 : f32
    %115 = vector.broadcast %cst_43 : f32 to vector<8x128xf32>
    %116 = arith.addf %115, %114 : vector<8x128xf32>
    %117 = arith.divf %115, %116 : vector<8x128xf32>
    %118 = math.tanh %108 : vector<8x128xf32>
    %119 = vector.extract_strided_slice %117 {offsets = [0, 0], sizes = [8, 32], strides = [1, 1]} : vector<8x128xf32> to vector<8x32xf32>
    %120 = vector.extract_strided_slice %117 {offsets = [0, 32], sizes = [8, 32], strides = [1, 1]} : vector<8x128xf32> to vector<8x32xf32>
    %121 = vector.extract_strided_slice %117 {offsets = [0, 96], sizes = [8, 32], strides = [1, 1]} : vector<8x128xf32> to vector<8x32xf32>
    %122 = vector.extract_strided_slice %118 {offsets = [0, 64], sizes = [8, 32], strides = [1, 1]} : vector<8x128xf32> to vector<8x32xf32>
    %123 = arith.mulf %120, %78 : vector<8x32xf32>
    %124 = arith.mulf %119, %122 : vector<8x32xf32>
    %125 = arith.addf %123, %124 : vector<8x32xf32>
    %126 = math.tanh %125 : vector<8x32xf32>
    %127 = arith.mulf %121, %126 : vector<8x32xf32>
    %128 = arith.negf %112 : vector<8x128xf32>
    %129 = math.exp %128 : vector<8x128xf32>
    %cst_44 = arith.constant 1.000000e+00 : f32
    %130 = vector.broadcast %cst_44 : f32 to vector<8x128xf32>
    %131 = arith.addf %130, %129 : vector<8x128xf32>
    %132 = arith.divf %130, %131 : vector<8x128xf32>
    %133 = math.tanh %112 : vector<8x128xf32>
    %134 = vector.extract_strided_slice %132 {offsets = [0, 0], sizes = [8, 32], strides = [1, 1]} : vector<8x128xf32> to vector<8x32xf32>
    %135 = vector.extract_strided_slice %132 {offsets = [0, 32], sizes = [8, 32], strides = [1, 1]} : vector<8x128xf32> to vector<8x32xf32>
    %136 = vector.extract_strided_slice %132 {offsets = [0, 96], sizes = [8, 32], strides = [1, 1]} : vector<8x128xf32> to vector<8x32xf32>
    %137 = vector.extract_strided_slice %133 {offsets = [0, 64], sizes = [8, 32], strides = [1, 1]} : vector<8x128xf32> to vector<8x32xf32>
    %138 = arith.mulf %135, %93 : vector<8x32xf32>
    %139 = arith.mulf %134, %137 : vector<8x32xf32>
    %140 = arith.addf %138, %139 : vector<8x32xf32>
    %141 = math.tanh %140 : vector<8x32xf32>
    %142 = arith.mulf %136, %141 : vector<8x32xf32>
    %c2_45 = arith.constant 2 : index
    %c0_46 = arith.constant 0 : index
    %c0_47 = arith.constant 0 : index
    %143 = vector.load %arg6[%c2_45, %c0_46, %c0_47] : memref<4x8x32xf32, #tpu.memory_space<vmem>>, vector<1x8x32xf32>
    %144 = vector.shape_cast %143 : vector<1x8x32xf32> to vector<8x32xf32>
    %145 = vector.shape_cast %127 : vector<8x32xf32> to vector<1x8x32xf32>
    tpu.vector_store %arg6[%c2_45, %c0_46, %c0_47], %145 {strides = array<i32>} : memref<4x8x32xf32, #tpu.memory_space<vmem>>, vector<1x8x32xf32>,
    %c1_48 = arith.constant 1 : index
    %c0_49 = arith.constant 0 : index
    %c0_50 = arith.constant 0 : index
    %146 = vector.load %arg7[%c1_48, %c0_49, %c0_50] : memref<4x8x32xf32, #tpu.memory_space<vmem>>, vector<1x8x32xf32>
    %147 = vector.shape_cast %146 : vector<1x8x32xf32> to vector<8x32xf32>
    %148 = vector.shape_cast %142 : vector<8x32xf32> to vector<1x8x32xf32>
    tpu.vector_store %arg7[%c1_48, %c0_49, %c0_50], %148 {strides = array<i32>} : memref<4x8x32xf32, #tpu.memory_space<vmem>>, vector<1x8x32xf32>,
    %149 = tpu.concatenate %127, %142 in 1 : vector<8x32xf32>, vector<8x32xf32> -> vector<8x64xf32>
    %150 = arith.truncf %149 : vector<8x64xf32> to vector<8x64xbf16>
    %cst_51 = arith.constant dense<0.000000e+00> : vector<8x256xf32>
    %151 = tpu.matmul %150, %3, %cst_51 {dimension_numbers = #tpu.dot_dimension_numbers<[1], [0], [0], [1], [0, 0, 1, 1], [], []>} : vector<8x64xbf16>, vector<64x256xbf16>, vector<8x256xf32> -> vector<8x256xf32>
    %c3_52 = arith.constant 3 : index
    %c0_53 = arith.constant 0 : index
    %c0_54 = arith.constant 0 : index
    %152 = vector.load %arg1[%c3_52, %c0_53, %c0_54] : memref<4x8x128xf32, #tpu.memory_space<vmem>>, vector<1x8x128xf32>
    %153 = vector.shape_cast %152 : vector<1x8x128xf32> to vector<8x128xf32>
    %154 = vector.extract_strided_slice %151 {offsets = [0, 0], sizes = [8, 128], strides = [1, 1]} : vector<8x256xf32> to vector<8x128xf32>
    %155 = arith.addf %153, %154 : vector<8x128xf32>
    %c0_55 = arith.constant 0 : index
    %c0_56 = arith.constant 0 : index
    %c0_57 = arith.constant 0 : index
    %156 = vector.load %arg2[%c0_55, %c0_56, %c0_57] : memref<4x8x128xf32, #tpu.memory_space<vmem>>, vector<1x8x128xf32>
    %157 = vector.shape_cast %156 : vector<1x8x128xf32> to vector<8x128xf32>
    %158 = vector.extract_strided_slice %151 {offsets = [0, 128], sizes = [8, 128], strides = [1, 1]} : vector<8x256xf32> to vector<8x128xf32>
    %159 = arith.addf %157, %158 : vector<8x128xf32>
    %160 = arith.negf %155 : vector<8x128xf32>
    %161 = math.exp %160 : vector<8x128xf32>
    %cst_58 = arith.constant 1.000000e+00 : f32
    %162 = vector.broadcast %cst_58 : f32 to vector<8x128xf32>
    %163 = arith.addf %162, %161 : vector<8x128xf32>
    %164 = arith.divf %162, %163 : vector<8x128xf32>
    %165 = math.tanh %155 : vector<8x128xf32>
    %166 = vector.extract_strided_slice %164 {offsets = [0, 0], sizes = [8, 32], strides = [1, 1]} : vector<8x128xf32> to vector<8x32xf32>
    %167 = vector.extract_strided_slice %164 {offsets = [0, 32], sizes = [8, 32], strides = [1, 1]} : vector<8x128xf32> to vector<8x32xf32>
    %168 = vector.extract_strided_slice %164 {offsets = [0, 96], sizes = [8, 32], strides = [1, 1]} : vector<8x128xf32> to vector<8x32xf32>
    %169 = vector.extract_strided_slice %165 {offsets = [0, 64], sizes = [8, 32], strides = [1, 1]} : vector<8x128xf32> to vector<8x32xf32>
    %170 = arith.mulf %167, %125 : vector<8x32xf32>
    %171 = arith.mulf %166, %169 : vector<8x32xf32>
    %172 = arith.addf %170, %171 : vector<8x32xf32>
    %173 = math.tanh %172 : vector<8x32xf32>
    %174 = arith.mulf %168, %173 : vector<8x32xf32>
    %175 = arith.negf %159 : vector<8x128xf32>
    %176 = math.exp %175 : vector<8x128xf32>
    %cst_59 = arith.constant 1.000000e+00 : f32
    %177 = vector.broadcast %cst_59 : f32 to vector<8x128xf32>
    %178 = arith.addf %177, %176 : vector<8x128xf32>
    %179 = arith.divf %177, %178 : vector<8x128xf32>
    %180 = math.tanh %159 : vector<8x128xf32>
    %181 = vector.extract_strided_slice %179 {offsets = [0, 0], sizes = [8, 32], strides = [1, 1]} : vector<8x128xf32> to vector<8x32xf32>
    %182 = vector.extract_strided_slice %179 {offsets = [0, 32], sizes = [8, 32], strides = [1, 1]} : vector<8x128xf32> to vector<8x32xf32>
    %183 = vector.extract_strided_slice %179 {offsets = [0, 96], sizes = [8, 32], strides = [1, 1]} : vector<8x128xf32> to vector<8x32xf32>
    %184 = vector.extract_strided_slice %180 {offsets = [0, 64], sizes = [8, 32], strides = [1, 1]} : vector<8x128xf32> to vector<8x32xf32>
    %185 = arith.mulf %182, %140 : vector<8x32xf32>
    %186 = arith.mulf %181, %184 : vector<8x32xf32>
    %187 = arith.addf %185, %186 : vector<8x32xf32>
    %188 = math.tanh %187 : vector<8x32xf32>
    %189 = arith.mulf %183, %188 : vector<8x32xf32>
    %c3_60 = arith.constant 3 : index
    %c0_61 = arith.constant 0 : index
    %c0_62 = arith.constant 0 : index
    %190 = vector.load %arg6[%c3_60, %c0_61, %c0_62] : memref<4x8x32xf32, #tpu.memory_space<vmem>>, vector<1x8x32xf32>
    %191 = vector.shape_cast %190 : vector<1x8x32xf32> to vector<8x32xf32>
    %192 = vector.shape_cast %174 : vector<8x32xf32> to vector<1x8x32xf32>
    tpu.vector_store %arg6[%c3_60, %c0_61, %c0_62], %192 {strides = array<i32>} : memref<4x8x32xf32, #tpu.memory_space<vmem>>, vector<1x8x32xf32>,
    %c0_63 = arith.constant 0 : index
    %c0_64 = arith.constant 0 : index
    %c0_65 = arith.constant 0 : index
    %193 = vector.load %arg7[%c0_63, %c0_64, %c0_65] : memref<4x8x32xf32, #tpu.memory_space<vmem>>, vector<1x8x32xf32>
    %194 = vector.shape_cast %193 : vector<1x8x32xf32> to vector<8x32xf32>
    %195 = vector.shape_cast %189 : vector<8x32xf32> to vector<1x8x32xf32>
    tpu.vector_store %arg7[%c0_63, %c0_64, %c0_65], %195 {strides = array<i32>} : memref<4x8x32xf32, #tpu.memory_space<vmem>>, vector<1x8x32xf32>,
    %196 = tpu.concatenate %174, %189 in 1 : vector<8x32xf32>, vector<8x32xf32> -> vector<8x64xf32>
    %c0_66 = arith.constant 0 : index
    %c0_67 = arith.constant 0 : index
    %197 = vector.load %arg10[%c0_66, %c0_67] : memref<8x64xf32, #tpu.memory_space<vmem>>, vector<8x64xf32>
    tpu.vector_store %arg10[%c0_66, %c0_67], %196 {strides = array<i32>} : memref<8x64xf32, #tpu.memory_space<vmem>>, vector<8x64xf32>,
    %c0_68 = arith.constant 0 : index
    %c0_69 = arith.constant 0 : index
    %c0_70 = arith.constant 0 : index
    %198 = vector.load %arg11[%c0_68, %c0_69, %c0_70] : memref<2x8x32xf32, #tpu.memory_space<vmem>>, vector<1x8x32xf32>
    %199 = vector.shape_cast %198 : vector<1x8x32xf32> to vector<8x32xf32>
    %200 = vector.shape_cast %172 : vector<8x32xf32> to vector<1x8x32xf32>
    tpu.vector_store %arg11[%c0_68, %c0_69, %c0_70], %200 {strides = array<i32>} : memref<2x8x32xf32, #tpu.memory_space<vmem>>, vector<1x8x32xf32>,
    %c1_71 = arith.constant 1 : index
    %c0_72 = arith.constant 0 : index
    %c0_73 = arith.constant 0 : index
    %201 = vector.load %arg11[%c1_71, %c0_72, %c0_73] : memref<2x8x32xf32, #tpu.memory_space<vmem>>, vector<1x8x32xf32>
    %202 = vector.shape_cast %201 : vector<1x8x32xf32> to vector<8x32xf32>
    %203 = vector.shape_cast %187 : vector<8x32xf32> to vector<1x8x32xf32>
    tpu.vector_store %arg11[%c1_71, %c0_72, %c0_73], %203 {strides = array<i32>} : memref<2x8x32xf32, #tpu.memory_space<vmem>>, vector<1x8x32xf32>,
    %c3_i32 = arith.constant 3 : i32
    %204 = arith.cmpi eq, %arg0, %c3_i32 : i32
    %205 = arith.extui %204 : i1 to i32
    %c0_i32_74 = arith.constant 0 : i32
    %206 = arith.cmpi ne, %205, %c0_i32_74 : i32
    scf.if %206 {
      %c0_75 = arith.constant 0 : index
      %c0_76 = arith.constant 0 : index
      %c0_77 = arith.constant 0 : index
      %207 = vector.load %arg8[%c0_75, %c0_76, %c0_77] : memref<2x8x32xf32, #tpu.memory_space<vmem>>, vector<1x8x32xf32>
      %208 = vector.shape_cast %207 : vector<1x8x32xf32> to vector<8x32xf32>
      %209 = vector.shape_cast %174 : vector<8x32xf32> to vector<1x8x32xf32>
      tpu.vector_store %arg8[%c0_75, %c0_76, %c0_77], %209 {strides = array<i32>} : memref<2x8x32xf32, #tpu.memory_space<vmem>>, vector<1x8x32xf32>,
      %c1_78 = arith.constant 1 : index
      %c0_79 = arith.constant 0 : index
      %c0_80 = arith.constant 0 : index
      %210 = vector.load %arg8[%c1_78, %c0_79, %c0_80] : memref<2x8x32xf32, #tpu.memory_space<vmem>>, vector<1x8x32xf32>
      %211 = vector.shape_cast %210 : vector<1x8x32xf32> to vector<8x32xf32>
      %212 = vector.shape_cast %189 : vector<8x32xf32> to vector<1x8x32xf32>
      tpu.vector_store %arg8[%c1_78, %c0_79, %c0_80], %212 {strides = array<i32>} : memref<2x8x32xf32, #tpu.memory_space<vmem>>, vector<1x8x32xf32>,
      %c0_81 = arith.constant 0 : index
      %c0_82 = arith.constant 0 : index
      %c0_83 = arith.constant 0 : index
      %213 = vector.load %arg9[%c0_81, %c0_82, %c0_83] : memref<2x8x32xf32, #tpu.memory_space<vmem>>, vector<1x8x32xf32>
      %214 = vector.shape_cast %213 : vector<1x8x32xf32> to vector<8x32xf32>
      %215 = vector.shape_cast %172 : vector<8x32xf32> to vector<1x8x32xf32>
      tpu.vector_store %arg9[%c0_81, %c0_82, %c0_83], %215 {strides = array<i32>} : memref<2x8x32xf32, #tpu.memory_space<vmem>>, vector<1x8x32xf32>,
      %c1_84 = arith.constant 1 : index
      %c0_85 = arith.constant 0 : index
      %c0_86 = arith.constant 0 : index
      %216 = vector.load %arg9[%c1_84, %c0_85, %c0_86] : memref<2x8x32xf32, #tpu.memory_space<vmem>>, vector<1x8x32xf32>
      %217 = vector.shape_cast %216 : vector<1x8x32xf32> to vector<8x32xf32>
      %218 = vector.shape_cast %187 : vector<8x32xf32> to vector<1x8x32xf32>
      tpu.vector_store %arg9[%c1_84, %c0_85, %c0_86], %218 {strides = array<i32>} : memref<2x8x32xf32, #tpu.memory_space<vmem>>, vector<1x8x32xf32>,
    } else {
    }
    return
  }
  func.func @transform_0(%arg0: i32) -> (i32, i32, i32) {
    %c0_i32 = arith.constant 0 : i32
    %c0_i32_0 = arith.constant 0 : i32
    %c0_i32_1 = arith.constant 0 : i32
    return %arg0, %c0_i32, %c0_i32_0 : i32, i32, i32
  }
  func.func @transform_1(%arg0: i32) -> (i32, i32, i32) {
    %c3_i32 = arith.constant 3 : i32
    %0 = arith.subi %c3_i32, %arg0 : i32
    %c0_i32 = arith.constant 0 : i32
    %c0_i32_0 = arith.constant 0 : i32
    %c0_i32_1 = arith.constant 0 : i32
    return %0, %c0_i32, %c0_i32_0 : i32, i32, i32
  }
  func.func @transform_2(%arg0: i32) -> (i32, i32) {
    %c0_i32 = arith.constant 0 : i32
    %c0_i32_0 = arith.constant 0 : i32
    %c0_i32_1 = arith.constant 0 : i32
    return %c0_i32, %c0_i32_0 : i32, i32
  }
  func.func @transform_3(%arg0: i32) -> (i32, i32) {
    %c0_i32 = arith.constant 0 : i32
    %c0_i32_0 = arith.constant 0 : i32
    %c0_i32_1 = arith.constant 0 : i32
    return %c0_i32, %c0_i32_0 : i32, i32
  }
  func.func @transform_4(%arg0: i32) -> (i32, i32, i32) {
    %c0_i32 = arith.constant 0 : i32
    %c0_i32_0 = arith.constant 0 : i32
    %c0_i32_1 = arith.constant 0 : i32
    %c0_i32_2 = arith.constant 0 : i32
    return %c0_i32, %c0_i32_0, %c0_i32_1 : i32, i32, i32
  }
  func.func @transform_5(%arg0: i32) -> (i32, i32, i32) {
    %c0_i32 = arith.constant 0 : i32
    %c0_i32_0 = arith.constant 0 : i32
    %c0_i32_1 = arith.constant 0 : i32
    return %arg0, %c0_i32, %c0_i32_0 : i32, i32, i32
  }
  func.func @transform_6(%arg0: i32) -> (i32, i32, i32) {
    %c3_i32 = arith.constant 3 : i32
    %0 = arith.subi %c3_i32, %arg0 : i32
    %c0_i32 = arith.constant 0 : i32
    %c0_i32_0 = arith.constant 0 : i32
    %c0_i32_1 = arith.constant 0 : i32
    return %0, %c0_i32, %c0_i32_0 : i32, i32, i32
  }
  func.func @transform_7(%arg0: i32) -> (i32, i32, i32) {
    %c0_i32 = arith.constant 0 : i32
    %c0_i32_0 = arith.constant 0 : i32
    %c0_i32_1 = arith.constant 0 : i32
    %c0_i32_2 = arith.constant 0 : i32
    return %c0_i32, %c0_i32_0, %c0_i32_1 : i32, i32, i32
  }
  func.func @transform_8(%arg0: i32) -> (i32, i32, i32) {
    %c0_i32 = arith.constant 0 : i32
    %c0_i32_0 = arith.constant 0 : i32
    %c0_i32_1 = arith.constant 0 : i32
    %c0_i32_2 = arith.constant 0 : i32
    return %c0_i32, %c0_i32_0, %c0_i32_1 : i32, i32, i32
  }
}

</mosaic_0001>

<bundles_post_ra>
// kernel: bi_encoder_rnn_forward.4
= control target key start
LH: loop header
LB: loop body
LE: loop exit
PB: predicated region body
PF: predicated region fallthrough
CT: control target
= control target key end

     0   :  { %vm77_vm0 = vcmask 457728   ;;  %vm102_vm1 = vcmask 1043456   ;;  %s784_s1 = inlined_call_operand.vmem [shape: bf16[1,56,128], index: 1, kind: input, shape index: {}]   ;;  %s785_s2 = inlined_call_operand.vmem [shape: bf16[1,56,128], index: 2, kind: input, shape index: {}]   ;;  %s786_s0 = inlined_call_operand.vmem [shape: f32[128,56], index: 0, kind: input, shape index: {}]   ;;  %s787_s3 = inlined_call_operand.vmem [shape: f32[1,128], index: 3, kind: input, shape index: {}]   ;;  %s788_s4 = inlined_call_operand.vmem [shape: f32[1,128], index: 4, kind: input, shape index: {}]   ;;  %s789_s5 = inlined_call_operand.vmem [shape: f32[128,128], index: 5, kind: output, shape index: {0}]   ;;  %s790_s6 = inlined_call_operand.vmem [shape: f32[128,128], index: 6, kind: output, shape index: {1}]  }
   0x1   :  { %v515_v0 = vld [vmem:[%s784_s1] sm:$0xff]   ;;  %v517_v2 = vld [vmem:[%s784_s1 + $0x8] sm:$0xff]   ;;  %v519_v4 = vld [vmem:[%s784_s1 + $0x10] sm:$0xff]  }
   0x2   :  { %v516_v1 = vld [vmem:[%s785_s2] sm:$0xff]   ;;  %465 = vmatprep.subr.bf16.mxu0 %v515_v0  ;;  %v518_v3 = vld [vmem:[%s785_s2 + $0x8] sm:$0xff]   ;;  %v520_v5 = vld [vmem:[%s785_s2 + $0x10] sm:$0xff]  }
   0x3   :  { %489 = vmatprep.subr.bf16.mxu1 %v516_v1  ;;  %466 = vmatpush3.bf16.msra.mxu0 %v515_v0  ;;  %v25_v6 = vld [vmem:[%s786_s0] sm:$0xff]  ;;  %v26_v7 = vld [vmem:[%s786_s0 + $0x8] sm:$0xff]  ;;  %v521_v8 = vld [vmem:[%s784_s1 + $0x18] ss:$0 sps:$4 sm:$0xff]  }
   0x4   :  { %490 = vmatpush3.bf16.msra.mxu1 %v516_v1  ;;  %467 = vmatprep.subr.bf16.mxu0 %v517_v2  ;;  %v41_v9 = vpack.c.bf16 %v26_v7, %v25_v6  ;;  %v522_v10 = vld [vmem:[%s785_s2 + $0x18] ss:$0 sps:$4 sm:$0xff]   ;;  %v27_v11 = vld [vmem:[%s786_s0 + $0x10] sm:$0xff]  ;;  %v104_v13 = vsel %vm102_vm1, %v521_v8, 0  ;;  %v29_v14 = vld [vmem:[%s786_s0 + $0x20] sm:$0xff] }
   0x5   :  { %491 = vmatprep.subr.bf16.mxu1 %v518_v3  ;;  %v28_v12 = vld [vmem:[%s786_s0 + $0x18] sm:$0xff]  ;;  %v30_v15 = vld [vmem:[%s786_s0 + $0x28] sm:$0xff]  ;;  %v254_v16 = vsel %vm102_vm1, %v522_v10, 0  ;;  %v31_v19 = vld [vmem:[%s786_s0 + $0x30] sm:$0xff] }
   0x6   :  { %473 = vmatprep.mubr.msk.bf16.mxu0 %vm77_vm0, %v41_v9  ;;  %497 = vmatprep.mubr.msk.bf16.mxu1 %vm77_vm0, %v41_v9  ;;  %v42_v17 = vpack.c.bf16 %v28_v12, %v27_v11  ;;  %v43_v18 = vpack.c.bf16 %v30_v15, %v29_v14  ;;  %v32_v20 = vld [vmem:[%s786_s0 + $0x38] sm:$0xff]  ;;  %v33_v21 = vld [vmem:[%s786_s0 + $0x40] sm:$0xff]  ;;  %v34_v22 = vld [vmem:[%s786_s0 + $0x48] sm:$0xff] }
   0x7   :  { %468 = vmatpush3.bf16.msra.mxu0 %v517_v2  ;;  %v44_v23 = vpack.c.bf16 %v32_v20, %v31_v19  ;;  %v45_v24 = vpack.c.bf16 %v34_v22, %v33_v21  ;;  %v35_v25 = vld [vmem:[%s786_s0 + $0x50] sm:$0xff]  ;;  %v36_v26 = vld [vmem:[%s786_s0 + $0x58] sm:$0xff]  ;;  %v37_v27 = vld [vmem:[%s786_s0 + $0x60] sm:$0xff] }
   0x8   :  { %492 = vmatpush3.bf16.msra.mxu1 %v518_v3  ;;  %469 = vmatprep.subr.bf16.mxu0 %v519_v4  ;;  %v38_v28 = vld [vmem:[%s786_s0 + $0x68] sm:$0xff]  ;;  %v46_v29 = vpack.c.bf16 %v36_v26, %v35_v25  ;;  %v39_v31 = vld [vmem:[%s786_s0 + $0x70] sm:$0xff]  ;;  %v40_v32 = vld [vmem:[%s786_s0 + $0x78] sm:$0xff] }
   0x9   :  { %493 = vmatprep.subr.bf16.mxu1 %v520_v5  ;;  %v47_v30 = vpack.c.bf16 %v38_v28, %v37_v27  ;;  %v48_v33 = vpack.c.bf16 %v40_v32, %v39_v31  ;;  %v649_v34 = vld [vmem:[%s787_s3] ss:$0 sm:$0xff] }
   0xa   :  { %v654_v35 = vld [vmem:[%s788_s4] ss:$0 sm:$0xff] }
   0xb   :  { %470 = vmatpush3.bf16.msra.mxu0 %v519_v4 }
   0xc   :  { %494 = vmatpush3.bf16.msra.mxu1 %v520_v5  ;;  %513 = vmatprep.subr.msk.bf16.mxu0 %vm102_vm1, %v521_v8 }
   0xd   :  { %514 = vmatprep.subr.msk.bf16.mxu1 %vm102_vm1, %v522_v10 }
   0xf   :  { %472 = vmatpush3.bf16.msra.mxu0 %v104_v13 }
  0x10   :  { %496 = vmatpush3.bf16.msra.mxu1 %v254_v16 }
  0x12   :  { %474 = vmatmul.mubr.msk.bf16.vlgmr.msra.gmra.mrb[0].mxu0 %vm77_vm0, %v42_v17 }
  0x13   :  { %498 = vmatmul.mubr.msk.bf16.vlgmr.msra.gmra.mrb[0].mxu1 %vm77_vm0, %v42_v17  ;;  %477 = vmatprep.mubr.msk.bf16.mxu0 %vm77_vm0, %v43_v18 }
  0x14   :  { %501 = vmatprep.mubr.msk.bf16.mxu1 %vm77_vm0, %v43_v18 }
  0x1a   :  { %478 = vmatmul.mubr.msk.bf16.gmra.mrb[4].mxu0 %vm77_vm0, %v44_v23 }
  0x1b   :  { %502 = vmatmul.mubr.msk.bf16.gmra.mrb[4].mxu1 %vm77_vm0, %v44_v23  ;;  %481 = vmatprep.mubr.msk.bf16.mxu0 %vm77_vm0, %v45_v24 }
  0x1c   :  { %505 = vmatprep.mubr.msk.bf16.mxu1 %vm77_vm0, %v45_v24 }
  0x22   :  { %482 = vmatmul.mubr.msk.bf16.gmra.mrb[8].mxu0 %vm77_vm0, %v46_v29 }
  0x23   :  { %506 = vmatmul.mubr.msk.bf16.gmra.mrb[8].mxu1 %vm77_vm0, %v46_v29  ;;  %485 = vmatprep.mubr.msk.bf16.mxu0 %vm77_vm0, %v47_v30 }
  0x24   :  { %509 = vmatprep.mubr.msk.bf16.mxu1 %vm77_vm0, %v47_v30 }
  0x2a   :  { %486 = vmatmul.mubr.msk.bf16.gmra.mrb[12].mxu0 %vm77_vm0, %v48_v33 }
  0x2b   :  { %510 = vmatmul.mubr.msk.bf16.gmra.mrb[12].mxu1 %vm77_vm0, %v48_v33 }
  0xe5   :  { %v475_v36 = vpop.f32.mrb[0].mxu0 }
  0xe6   :  { %v211_v37 = vadd.f32 %v475_v36, %v649_v34  ;;  %v499_v38 = vpop.f32.mrb[0].mxu1  ;;  %v140_v39 = vpop.f32.mrb[1].mxu0 }
  0xe7   :  { %v361_v40 = vadd.f32 %v499_v38, %v654_v35  ;;  %v209_v41 = vadd.f32 %v649_v34, %v140_v39  ;;  %v290_v42 = vpop.f32.mrb[1].mxu1  ;;  %v476_v43 = vpop.f32.mrb[2].mxu0 }
  0xe8   :  { %377 = vst [vmem:[%s789_s5 + $0x10] sm:$0xff] %v211_v37  ;;  %v359_v44 = vadd.f32 %v654_v35, %v290_v42  ;;  %v212_v45 = vadd.f32 %v476_v43, %v649_v34  ;;  %v500_v46 = vpop.f32.mrb[2].mxu1  ;;  %v143_v47 = vpop.f32.mrb[3].mxu0 }
  0xe9   :  { %393 = vst [vmem:[%s790_s6 + $0x10] sm:$0xff] %v361_v40  ;;  %375 = vst [vmem:[%s789_s5] sm:$0xff] %v209_v41  ;;  %v362_v48 = vadd.f32 %v500_v46, %v654_v35  ;;  %v210_v49 = vadd.f32 %v649_v34, %v143_v47  ;;  %v293_v50 = vpop.f32.mrb[3].mxu1 }
  0xea   :  { %391 = vst [vmem:[%s790_s6] sm:$0xff] %v359_v44  ;;  %378 = vst [vmem:[%s789_s5 + $0x18] sm:$0xff] %v212_v45  ;;  %v360_v51 = vadd.f32 %v654_v35, %v293_v50 }
  0xeb   :  { %394 = vst [vmem:[%s790_s6 + $0x18] sm:$0xff] %v362_v48  ;;  %376 = vst [vmem:[%s789_s5 + $0x8] sm:$0xff] %v210_v49 }
  0xec   :  { %392 = vst [vmem:[%s790_s6 + $0x8] sm:$0xff] %v360_v51 }
  0xed   :  { %v479_v52 = vpop.f32.mrb[4].mxu0 }
  0xee   :  { %v215_v53 = vadd.f32 %v479_v52, %v649_v34  ;;  %v503_v54 = vpop.f32.mrb[4].mxu1  ;;  %v156_v55 = vpop.f32.mrb[5].mxu0 }
  0xef   :  { %v365_v56 = vadd.f32 %v503_v54, %v654_v35  ;;  %v213_v57 = vadd.f32 %v649_v34, %v156_v55  ;;  %v306_v58 = vpop.f32.mrb[5].mxu1  ;;  %v480_v59 = vpop.f32.mrb[6].mxu0 }
  0xf0   :  { %381 = vst [vmem:[%s789_s5 + $0x30] sm:$0xff] %v215_v53  ;;  %v363_v60 = vadd.f32 %v654_v35, %v306_v58  ;;  %v216_v61 = vadd.f32 %v480_v59, %v649_v34  ;;  %v504_v62 = vpop.f32.mrb[6].mxu1  ;;  %v159_v63 = vpop.f32.mrb[7].mxu0 }
  0xf1   :  { %397 = vst [vmem:[%s790_s6 + $0x30] sm:$0xff] %v365_v56  ;;  %379 = vst [vmem:[%s789_s5 + $0x20] sm:$0xff] %v213_v57  ;;  %v366_v0 = vadd.f32 %v504_v62, %v654_v35  ;;  %v214_v1 = vadd.f32 %v649_v34, %v159_v63  ;;  %v309_v2 = vpop.f32.mrb[7].mxu1 }
  0xf2   :  { %395 = vst [vmem:[%s790_s6 + $0x20] sm:$0xff] %v363_v60  ;;  %382 = vst [vmem:[%s789_s5 + $0x38] sm:$0xff] %v216_v61  ;;  %v364_v3 = vadd.f32 %v654_v35, %v309_v2 }
  0xf3   :  { %398 = vst [vmem:[%s790_s6 + $0x38] sm:$0xff] %v366_v0  ;;  %380 = vst [vmem:[%s789_s5 + $0x28] sm:$0xff] %v214_v1 }
  0xf4   :  { %396 = vst [vmem:[%s790_s6 + $0x28] sm:$0xff] %v364_v3 }
  0xf5   :  { %v483_v4 = vpop.f32.mrb[8].mxu0 }
  0xf6   :  { %v219_v5 = vadd.f32 %v483_v4, %v649_v34  ;;  %v507_v6 = vpop.f32.mrb[8].mxu1  ;;  %v172_v7 = vpop.f32.mrb[9].mxu0 }
  0xf7   :  { %v369_v8 = vadd.f32 %v507_v6, %v654_v35  ;;  %v217_v9 = vadd.f32 %v649_v34, %v172_v7  ;;  %v322_v10 = vpop.f32.mrb[9].mxu1  ;;  %v484_v11 = vpop.f32.mrb[10].mxu0 }
  0xf8   :  { %385 = vst [vmem:[%s789_s5 + $0x50] sm:$0xff] %v219_v5  ;;  %v367_v12 = vadd.f32 %v654_v35, %v322_v10  ;;  %v220_v13 = vadd.f32 %v484_v11, %v649_v34  ;;  %v508_v14 = vpop.f32.mrb[10].mxu1  ;;  %v175_v15 = vpop.f32.mrb[11].mxu0 }
  0xf9   :  { %401 = vst [vmem:[%s790_s6 + $0x50] sm:$0xff] %v369_v8  ;;  %383 = vst [vmem:[%s789_s5 + $0x40] sm:$0xff] %v217_v9  ;;  %v370_v16 = vadd.f32 %v508_v14, %v654_v35  ;;  %v218_v17 = vadd.f32 %v649_v34, %v175_v15  ;;  %v325_v18 = vpop.f32.mrb[11].mxu1 }
  0xfa   :  { %399 = vst [vmem:[%s790_s6 + $0x40] sm:$0xff] %v367_v12  ;;  %386 = vst [vmem:[%s789_s5 + $0x58] sm:$0xff] %v220_v13  ;;  %v368_v19 = vadd.f32 %v654_v35, %v325_v18 }
  0xfb   :  { %402 = vst [vmem:[%s790_s6 + $0x58] sm:$0xff] %v370_v16  ;;  %384 = vst [vmem:[%s789_s5 + $0x48] sm:$0xff] %v218_v17 }
  0xfc   :  { %400 = vst [vmem:[%s790_s6 + $0x48] sm:$0xff] %v368_v19 }
  0xfd   :  { %v487_v20 = vpop.f32.mrb[12].mxu0 }
  0xfe   :  { %v223_v21 = vadd.f32 %v487_v20, %v649_v34  ;;  %v511_v22 = vpop.f32.mrb[12].mxu1  ;;  %v188_v23 = vpop.f32.mrb[13].mxu0 }
  0xff   :  { %v373_v24 = vadd.f32 %v511_v22, %v654_v35  ;;  %v221_v25 = vadd.f32 %v649_v34, %v188_v23  ;;  %v338_v26 = vpop.f32.mrb[13].mxu1  ;;  %v488_v27 = vpop.f32.mrb[14].mxu0 }
 0x100   :  { %389 = vst [vmem:[%s789_s5 + $0x70] sm:$0xff] %v223_v21  ;;  %v371_v28 = vadd.f32 %v654_v35, %v338_v26  ;;  %v224_v29 = vadd.f32 %v488_v27, %v649_v34  ;;  %v512_v30 = vpop.f32.mrb[14].mxu1  ;;  %v191_v31 = vpop.f32.mrb[15].mxu0 }
 0x101   :  { %405 = vst [vmem:[%s790_s6 + $0x70] sm:$0xff] %v373_v24  ;;  %387 = vst [vmem:[%s789_s5 + $0x60] sm:$0xff] %v221_v25  ;;  %v374_v32 = vadd.f32 %v512_v30, %v654_v35  ;;  %v222_v33 = vadd.f32 %v649_v34, %v191_v31  ;;  %v341_v36 = vpop.f32.mrb[15].mxu1 }
 0x102   :  { %403 = vst [vmem:[%s790_s6 + $0x60] sm:$0xff] %v371_v28  ;;  %390 = vst [vmem:[%s789_s5 + $0x78] sm:$0xff] %v224_v29  ;;  %v372_v37 = vadd.f32 %v654_v35, %v341_v36 }
 0x103   :  { %406 = vst [vmem:[%s790_s6 + $0x78] sm:$0xff] %v374_v32  ;;  %388 = vst [vmem:[%s789_s5 + $0x68] sm:$0xff] %v222_v33 }
 0x104   :  { %404 = vst [vmem:[%s790_s6 + $0x68] sm:$0xff] %v372_v37 }

// kernel: bi_encoder_rnn_forward.6
= control target key start
LH: loop header
LB: loop body
LE: loop exit
PB: predicated region body
PF: predicated region fallthrough
CT: control target
= control target key end

     0   :  { %vm68_vm0 = vcmask 261120   ;;  %s1267_s2 = inlined_call_operand.vmem [shape: bf16[2,32,128], index: 2, kind: input, shape index: {}]   ;;  %s1268_s3 = inlined_call_operand.vmem [shape: bf16[2,32,128], index: 3, kind: input, shape index: {}]   ;;  %s1269_s0 = inlined_call_operand.vmem [shape: f32[128,32], index: 0, kind: input, shape index: {}]   ;;  %s1270_s1 = inlined_call_operand.vmem [shape: f32[128,32], index: 1, kind: input, shape index: {}]   ;;  %s1271_s4 = inlined_call_operand.vmem [shape: f32[1,128], index: 4, kind: input, shape index: {}]   ;;  %s1272_s5 = inlined_call_operand.vmem [shape: f32[1,128], index: 5, kind: input, shape index: {}]   ;;  %s1273_s6 = inlined_call_operand.vmem [shape: f32[128,128], index: 6, kind: output, shape index: {0}]   ;;  %s1274_s7 = inlined_call_operand.vmem [shape: f32[128,128], index: 7, kind: output, shape index: {1}]  }
   0x1   :  { %v929_v0 = vld [vmem:[%s1267_s2] sm:$0xff]   ;;  %v931_v2 = vld [vmem:[%s1267_s2 + $0x8] sm:$0xff]   ;;  %v30_v6 = vld [vmem:[%s1269_s0 + $0x10] sm:$0xff] }
   0x2   :  { %v930_v1 = vld [vmem:[%s1268_s3] sm:$0xff]   ;;  %785 = vmatprep.subr.bf16.mxu0 %v929_v0  ;;  %v932_v3 = vld [vmem:[%s1268_s3 + $0x8] sm:$0xff]   ;;  %v31_v8 = vld [vmem:[%s1269_s0 + $0x18] sm:$0xff] }
   0x3   :  { %805 = vmatprep.subr.bf16.mxu1 %v930_v1  ;;  %786 = vmatpush3.bf16.msra.mxu0 %v929_v0  ;;  %v28_v4 = vld [vmem:[%s1269_s0] sm:$0xff]  ;;  %v29_v5 = vld [vmem:[%s1269_s0 + $0x8] sm:$0xff]  ;;  %v45_v9 = vpack.c.bf16 %v31_v8, %v30_v6  ;;  %v933_v10 = vld [vmem:[%s1267_s2 + $0x10] sm:$0xff]  }
   0x4   :  { %806 = vmatpush3.bf16.msra.mxu1 %v930_v1  ;;  %787 = vmatprep.subr.bf16.mxu0 %v931_v2  ;;  %v44_v7 = vpack.c.bf16 %v29_v5, %v28_v4  ;;  %v934_v11 = vld [vmem:[%s1268_s3 + $0x10] sm:$0xff]   ;;  %v32_v12 = vld [vmem:[%s1269_s0 + $0x20] sm:$0xff]  ;;  %v33_v13 = vld [vmem:[%s1269_s0 + $0x28] sm:$0xff] }
   0x5   :  { %807 = vmatprep.subr.bf16.mxu1 %v932_v3  ;;  %v46_v14 = vpack.c.bf16 %v33_v13, %v32_v12  ;;  %v34_v15 = vld [vmem:[%s1269_s0 + $0x30] sm:$0xff]  ;;  %v35_v16 = vld [vmem:[%s1269_s0 + $0x38] sm:$0xff]  ;;  %v36_v19 = vld [vmem:[%s1269_s0 + $0x40] sm:$0xff] }
   0x6   :  { %789 = vmatprep.mubr.msk.bf16.mxu0 %vm68_vm0, %v44_v7  ;;  %809 = vmatprep.mubr.msk.bf16.mxu1 %vm68_vm0, %v44_v7  ;;  %v935_v17 = vld [vmem:[%s1267_s2 + $0x18] sm:$0xff]   ;;  %v37_v20 = vld [vmem:[%s1269_s0 + $0x48] sm:$0xff]  ;;  %v47_v21 = vpack.c.bf16 %v35_v16, %v34_v15  ;;  %v38_v23 = vld [vmem:[%s1269_s0 + $0x50] sm:$0xff] }
   0x7   :  { %788 = vmatpush3.bf16.msra.mxu0 %v931_v2  ;;  %v936_v18 = vld [vmem:[%s1268_s3 + $0x18] sm:$0xff]   ;;  %v48_v22 = vpack.c.bf16 %v37_v20, %v36_v19  ;;  %v40_v25 = vld [vmem:[%s1269_s0 + $0x60] sm:$0xff]  ;;  %v41_v26 = vld [vmem:[%s1269_s0 + $0x68] sm:$0xff] }
   0x8   :  { %808 = vmatpush3.bf16.msra.mxu1 %v932_v3  ;;  %825 = vmatprep.subr.bf16.mxu0 %v933_v10  ;;  %v39_v24 = vld [vmem:[%s1269_s0 + $0x58] sm:$0xff]  ;;  %v50_v28 = vpack.c.bf16 %v41_v26, %v40_v25  ;;  %v42_v29 = vld [vmem:[%s1269_s0 + $0x70] sm:$0xff]  ;;  %v347_v31 = vld [vmem:[%s1270_s1] sm:$0xff] }
   0x9   :  { %845 = vmatprep.subr.bf16.mxu1 %v934_v11  ;;  %v49_v27 = vpack.c.bf16 %v39_v24, %v38_v23  ;;  %v43_v30 = vld [vmem:[%s1269_s0 + $0x78] sm:$0xff]  ;;  %v348_v32 = vld [vmem:[%s1270_s1 + $0x8] sm:$0xff]  ;;  %v349_v35 = vld [vmem:[%s1270_s1 + $0x10] sm:$0xff] }
   0xa   :  { %790 = vmatmul.mubr.msk.bf16.vlgmr.msra.gmra.mrb[0].mxu0 %vm68_vm0, %v45_v9  ;;  %v51_v33 = vpack.c.bf16 %v43_v30, %v42_v29  ;;  %v363_v34 = vpack.c.bf16 %v348_v32, %v347_v31  ;;  %v350_v36 = vld [vmem:[%s1270_s1 + $0x18] sm:$0xff]  ;;  %v351_v37 = vld [vmem:[%s1270_s1 + $0x20] sm:$0xff]  ;;  %v352_v38 = vld [vmem:[%s1270_s1 + $0x28] sm:$0xff] }
   0xb   :  { %810 = vmatmul.mubr.msk.bf16.vlgmr.msra.gmra.mrb[0].mxu1 %vm68_vm0, %v45_v9  ;;  %826 = vmatpush3.bf16.msra.mxu0 %v933_v10  ;;  %v364_v39 = vpack.c.bf16 %v350_v36, %v349_v35  ;;  %v365_v40 = vpack.c.bf16 %v352_v38, %v351_v37  ;;  %v353_v41 = vld [vmem:[%s1270_s1 + $0x30] sm:$0xff]  ;;  %v354_v42 = vld [vmem:[%s1270_s1 + $0x38] sm:$0xff]  ;;  %v355_v43 = vld [vmem:[%s1270_s1 + $0x40] sm:$0xff] }
   0xc   :  { %846 = vmatpush3.bf16.msra.mxu1 %v934_v11  ;;  %793 = vmatprep.mubr.msk.bf16.mxu0 %vm68_vm0, %v46_v14  ;;  %v356_v44 = vld [vmem:[%s1270_s1 + $0x48] sm:$0xff]  ;;  %v366_v45 = vpack.c.bf16 %v354_v42, %v353_v41  ;;  %v357_v47 = vld [vmem:[%s1270_s1 + $0x50] sm:$0xff]  ;;  %v358_v48 = vld [vmem:[%s1270_s1 + $0x58] sm:$0xff] }
   0xd   :  { %813 = vmatprep.mubr.msk.bf16.mxu1 %vm68_vm0, %v46_v14  ;;  %827 = vmatprep.subr.bf16.mxu0 %v935_v17  ;;  %v367_v46 = vpack.c.bf16 %v356_v44, %v355_v43  ;;  %v359_v49 = vld [vmem:[%s1270_s1 + $0x60] sm:$0xff]  ;;  %v360_v50 = vld [vmem:[%s1270_s1 + $0x68] sm:$0xff]  ;;  %v368_v51 = vpack.c.bf16 %v358_v48, %v357_v47  ;;  %v361_v53 = vld [vmem:[%s1270_s1 + $0x70] sm:$0xff] }
   0xe   :  { %847 = vmatprep.subr.bf16.mxu1 %v936_v18  ;;  %v369_v52 = vpack.c.bf16 %v360_v50, %v359_v49  ;;  %v362_v54 = vld [vmem:[%s1270_s1 + $0x78] sm:$0xff]  ;;  %v1132_v56 = vld [vmem:[%s1271_s4] ss:$0 sm:$0xff] }
   0xf   :  { %828 = vmatpush3.bf16.msra.mxu0 %v935_v17  ;;  %v370_v55 = vpack.c.bf16 %v362_v54, %v361_v53  ;;  %v1137_v57 = vld [vmem:[%s1272_s5] ss:$0 sm:$0xff] }
  0x10   :  { %848 = vmatpush3.bf16.msra.mxu1 %v936_v18 }
  0x12   :  { %794 = vmatmul.mubr.msk.bf16.gmra.mrb[4].mxu0 %vm68_vm0, %v47_v21 }
  0x13   :  { %814 = vmatmul.mubr.msk.bf16.gmra.mrb[4].mxu1 %vm68_vm0, %v47_v21  ;;  %797 = vmatprep.mubr.msk.bf16.mxu0 %vm68_vm0, %v48_v22 }
  0x14   :  { %817 = vmatprep.mubr.msk.bf16.mxu1 %vm68_vm0, %v48_v22 }
  0x1a   :  { %798 = vmatmul.mubr.msk.bf16.gmra.mrb[8].mxu0 %vm68_vm0, %v49_v27 }
  0x1b   :  { %818 = vmatmul.mubr.msk.bf16.gmra.mrb[8].mxu1 %vm68_vm0, %v49_v27  ;;  %801 = vmatprep.mubr.msk.bf16.mxu0 %vm68_vm0, %v50_v28 }
  0x1c   :  { %821 = vmatprep.mubr.msk.bf16.mxu1 %vm68_vm0, %v50_v28 }
  0x22   :  { %802 = vmatmul.mubr.msk.bf16.gmra.mrb[12].mxu0 %vm68_vm0, %v51_v33 }
  0x23   :  { %822 = vmatmul.mubr.msk.bf16.gmra.mrb[12].mxu1 %vm68_vm0, %v51_v33  ;;  %829 = vmatprep.mubr.msk.bf16.mxu0 %vm68_vm0, %v363_v34 }
  0x24   :  { %849 = vmatprep.mubr.msk.bf16.mxu1 %vm68_vm0, %v363_v34 }
  0x2a   :  { %830 = vmatmul.mubr.msk.bf16.vlgmr.msra.gmra.mrb[0].mxu0 %vm68_vm0, %v364_v39 }
  0x2b   :  { %850 = vmatmul.mubr.msk.bf16.vlgmr.msra.gmra.mrb[0].mxu1 %vm68_vm0, %v364_v39  ;;  %833 = vmatprep.mubr.msk.bf16.mxu0 %vm68_vm0, %v365_v40 }
  0x2c   :  { %853 = vmatprep.mubr.msk.bf16.mxu1 %vm68_vm0, %v365_v40 }
  0x32   :  { %834 = vmatmul.mubr.msk.bf16.gmra.mrb[4].mxu0 %vm68_vm0, %v366_v45 }
  0x33   :  { %854 = vmatmul.mubr.msk.bf16.gmra.mrb[4].mxu1 %vm68_vm0, %v366_v45  ;;  %837 = vmatprep.mubr.msk.bf16.mxu0 %vm68_vm0, %v367_v46 }
  0x34   :  { %857 = vmatprep.mubr.msk.bf16.mxu1 %vm68_vm0, %v367_v46 }
  0x3a   :  { %838 = vmatmul.mubr.msk.bf16.gmra.mrb[8].mxu0 %vm68_vm0, %v368_v51 }
  0x3b   :  { %858 = vmatmul.mubr.msk.bf16.gmra.mrb[8].mxu1 %vm68_vm0, %v368_v51  ;;  %841 = vmatprep.mubr.msk.bf16.mxu0 %vm68_vm0, %v369_v52 }
  0x3c   :  { %861 = vmatprep.mubr.msk.bf16.mxu1 %vm68_vm0, %v369_v52 }
  0x42   :  { %842 = vmatmul.mubr.msk.bf16.gmra.mrb[12].mxu0 %vm68_vm0, %v370_v55 }
  0x43   :  { %862 = vmatmul.mubr.msk.bf16.gmra.mrb[12].mxu1 %vm68_vm0, %v370_v55 }
  0xfd   :  { %v831_v58 = vpop.f32.mrb[0].mxu0 }
  0xfe   :  { %v865_v59 = vadd.f32 %v831_v58, %v1132_v56  ;;  %v851_v60 = vpop.f32.mrb[0].mxu1  ;;  %v446_v61 = vpop.f32.mrb[1].mxu0 }
  0xff   :  { %v881_v62 = vadd.f32 %v851_v60, %v1137_v57  ;;  %v866_v63 = vadd.f32 %v1132_v56, %v446_v61  ;;  %v576_v0 = vpop.f32.mrb[1].mxu1  ;;  %v832_v1 = vpop.f32.mrb[2].mxu0 }
 0x100   :  { %657 = vst [vmem:[%s1273_s6 + $0x10] sm:$0xff] %v865_v59  ;;  %v882_v2 = vadd.f32 %v1137_v57, %v576_v0  ;;  %v867_v3 = vadd.f32 %v832_v1, %v1132_v56  ;;  %v852_v4 = vpop.f32.mrb[2].mxu1  ;;  %v449_v5 = vpop.f32.mrb[3].mxu0 }
 0x101   :  { %673 = vst [vmem:[%s1274_s7 + $0x10] sm:$0xff] %v881_v62  ;;  %655 = vst [vmem:[%s1273_s6] sm:$0xff] %v866_v63  ;;  %v883_v6 = vadd.f32 %v852_v4, %v1137_v57  ;;  %v868_v7 = vadd.f32 %v1132_v56, %v449_v5  ;;  %v579_v8 = vpop.f32.mrb[3].mxu1 }
 0x102   :  { %671 = vst [vmem:[%s1274_s7] sm:$0xff] %v882_v2  ;;  %658 = vst [vmem:[%s1273_s6 + $0x18] sm:$0xff] %v867_v3  ;;  %v884_v9 = vadd.f32 %v1137_v57, %v579_v8 }
 0x103   :  { %674 = vst [vmem:[%s1274_s7 + $0x18] sm:$0xff] %v883_v6  ;;  %656 = vst [vmem:[%s1273_s6 + $0x8] sm:$0xff] %v868_v7 }
 0x104   :  { %672 = vst [vmem:[%s1274_s7 + $0x8] sm:$0xff] %v884_v9 }
 0x105   :  { %v835_v10 = vpop.f32.mrb[4].mxu0 }
 0x106   :  { %v869_v11 = vadd.f32 %v835_v10, %v1132_v56  ;;  %v855_v12 = vpop.f32.mrb[4].mxu1  ;;  %v462_v13 = vpop.f32.mrb[5].mxu0 }
 0x107   :  { %v885_v14 = vadd.f32 %v855_v12, %v1137_v57  ;;  %v870_v15 = vadd.f32 %v1132_v56, %v462_v13  ;;  %v592_v16 = vpop.f32.mrb[5].mxu1  ;;  %v836_v17 = vpop.f32.mrb[6].mxu0 }
 0x108   :  { %661 = vst [vmem:[%s1273_s6 + $0x30] sm:$0xff] %v869_v11  ;;  %v886_v18 = vadd.f32 %v1137_v57, %v592_v16  ;;  %v871_v19 = vadd.f32 %v836_v17, %v1132_v56  ;;  %v856_v20 = vpop.f32.mrb[6].mxu1  ;;  %v465_v21 = vpop.f32.mrb[7].mxu0 }
 0x109   :  { %677 = vst [vmem:[%s1274_s7 + $0x30] sm:$0xff] %v885_v14  ;;  %659 = vst [vmem:[%s1273_s6 + $0x20] sm:$0xff] %v870_v15  ;;  %v887_v22 = vadd.f32 %v856_v20, %v1137_v57  ;;  %v872_v23 = vadd.f32 %v1132_v56, %v465_v21  ;;  %v595_v24 = vpop.f32.mrb[7].mxu1 }
 0x10a   :  { %675 = vst [vmem:[%s1274_s7 + $0x20] sm:$0xff] %v886_v18  ;;  %662 = vst [vmem:[%s1273_s6 + $0x38] sm:$0xff] %v871_v19  ;;  %v888_v25 = vadd.f32 %v1137_v57, %v595_v24 }
 0x10b   :  { %678 = vst [vmem:[%s1274_s7 + $0x38] sm:$0xff] %v887_v22  ;;  %660 = vst [vmem:[%s1273_s6 + $0x28] sm:$0xff] %v872_v23 }
 0x10c   :  { %676 = vst [vmem:[%s1274_s7 + $0x28] sm:$0xff] %v888_v25 }
 0x10d   :  { %v839_v26 = vpop.f32.mrb[8].mxu0 }
 0x10e   :  { %v873_v27 = vadd.f32 %v839_v26, %v1132_v56  ;;  %v859_v28 = vpop.f32.mrb[8].mxu1  ;;  %v478_v29 = vpop.f32.mrb[9].mxu0 }
 0x10f   :  { %v889_v30 = vadd.f32 %v859_v28, %v1137_v57  ;;  %v874_v31 = vadd.f32 %v1132_v56, %v478_v29  ;;  %v608_v32 = vpop.f32.mrb[9].mxu1  ;;  %v840_v33 = vpop.f32.mrb[10].mxu0 }
 0x110   :  { %665 = vst [vmem:[%s1273_s6 + $0x50] sm:$0xff] %v873_v27  ;;  %v890_v34 = vadd.f32 %v1137_v57, %v608_v32  ;;  %v875_v35 = vadd.f32 %v840_v33, %v1132_v56  ;;  %v860_v36 = vpop.f32.mrb[10].mxu1  ;;  %v481_v37 = vpop.f32.mrb[11].mxu0 }
 0x111   :  { %681 = vst [vmem:[%s1274_s7 + $0x50] sm:$0xff] %v889_v30  ;;  %663 = vst [vmem:[%s1273_s6 + $0x40] sm:$0xff] %v874_v31  ;;  %v891_v38 = vadd.f32 %v860_v36, %v1137_v57  ;;  %v876_v39 = vadd.f32 %v1132_v56, %v481_v37  ;;  %v611_v40 = vpop.f32.mrb[11].mxu1 }
 0x112   :  { %679 = vst [vmem:[%s1274_s7 + $0x40] sm:$0xff] %v890_v34  ;;  %666 = vst [vmem:[%s1273_s6 + $0x58] sm:$0xff] %v875_v35  ;;  %v892_v41 = vadd.f32 %v1137_v57, %v611_v40 }
 0x113   :  { %682 = vst [vmem:[%s1274_s7 + $0x58] sm:$0xff] %v891_v38  ;;  %664 = vst [vmem:[%s1273_s6 + $0x48] sm:$0xff] %v876_v39 }
 0x114   :  { %680 = vst [vmem:[%s1274_s7 + $0x48] sm:$0xff] %v892_v41 }
 0x115   :  { %v843_v42 = vpop.f32.mrb[12].mxu0 }
 0x116   :  { %v877_v43 = vadd.f32 %v843_v42, %v1132_v56  ;;  %v863_v44 = vpop.f32.mrb[12].mxu1  ;;  %v494_v45 = vpop.f32.mrb[13].mxu0 }
 0x117   :  { %v893_v46 = vadd.f32 %v863_v44, %v1137_v57  ;;  %v878_v47 = vadd.f32 %v1132_v56, %v494_v45  ;;  %v624_v48 = vpop.f32.mrb[13].mxu1  ;;  %v844_v49 = vpop.f32.mrb[14].mxu0 }
 0x118   :  { %669 = vst [vmem:[%s1273_s6 + $0x70] sm:$0xff] %v877_v43  ;;  %v894_v50 = vadd.f32 %v1137_v57, %v624_v48  ;;  %v879_v51 = vadd.f32 %v844_v49, %v1132_v56  ;;  %v864_v52 = vpop.f32.mrb[14].mxu1  ;;  %v497_v53 = vpop.f32.mrb[15].mxu0 }
 0x119   :  { %685 = vst [vmem:[%s1274_s7 + $0x70] sm:$0xff] %v893_v46  ;;  %667 = vst [vmem:[%s1273_s6 + $0x60] sm:$0xff] %v878_v47  ;;  %v895_v54 = vadd.f32 %v864_v52, %v1137_v57  ;;  %v880_v55 = vadd.f32 %v1132_v56, %v497_v53  ;;  %v627_v58 = vpop.f32.mrb[15].mxu1 }
 0x11a   :  { %683 = vst [vmem:[%s1274_s7 + $0x60] sm:$0xff] %v894_v50  ;;  %670 = vst [vmem:[%s1273_s6 + $0x78] sm:$0xff] %v879_v51  ;;  %v896_v59 = vadd.f32 %v1137_v57, %v627_v58 }
 0x11b   :  { %686 = vst [vmem:[%s1274_s7 + $0x78] sm:$0xff] %v895_v54  ;;  %668 = vst [vmem:[%s1273_s6 + $0x68] sm:$0xff] %v880_v55 }
 0x11c   :  { %684 = vst [vmem:[%s1274_s7 + $0x68] sm:$0xff] %v896_v59 }

// kernel: bi_encoder_rnn_forward.5
= control target key start
LH: loop header
LB: loop body
LE: loop exit
PB: predicated region body
PF: predicated region fallthrough
CT: control target
= control target key end

     0   :  { %s1216_s27 = smov 0   ;;  %s1433_s0 = inlined_call_operand.vmem [shape: f32[16,8,128], index: 0, kind: input, shape index: {}]   ;;  %s1434_s1 = inlined_call_operand.vmem [shape: f32[16,8,128], index: 1, kind: input, shape index: {}]   ;;  %s1435_s2 = inlined_call_operand.vmem [shape: bf16[64,256], index: 2, kind: input, shape index: {}]   ;;  %s1436_s3 = inlined_call_operand.vmem [shape: f32[8,64], index: 3, kind: input, shape index: {}]   ;;  %s1437_s4 = inlined_call_operand.vmem [shape: f32[2,8,32], index: 4, kind: input, shape index: {}]   ;;  %s1438_s5 = inlined_call_operand.vmem [shape: f32[16,8,32], index: 5, kind: output, shape index: {0}]   ;;  %s1439_s6 = inlined_call_operand.vmem [shape: f32[16,8,32], index: 6, kind: output, shape index: {1}]   ;;  %s1440_s7 = inlined_call_operand.vmem [shape: f32[2,8,32], index: 7, kind: output, shape index: {2}]   ;;  %s1441_s8 = inlined_call_operand.vmem [shape: f32[2,8,32], index: 8, kind: output, shape index: {3}]  }
   0x1 LB: > { %s1222_s28 = sadd.s32 4294967295, %s1165_s27   ;;  %p1024_p0 = scmp.ge.s32.totalorder %s1165_s27, 1  ;;  %s1165_s27 = sphi %s1216_s27, %s19_s27  }
   0x2   : > { %p277_p1 = scmp.lt.s32.totalorder %s1165_s27, 5 }
   0x4   : > { %p278_p2 = pnand %p1024_p0, %p277_p1 }
   0x5   : > { %s1025_s29 = sshll.u32 (!%p278_p2), %s1222_s28, 2  ;;  %s329_s30 = ssub.s32 (!%p278_p2), 3, %s1222_s28 }
   0x6   : > { %281 = sbr.rel (%p278_p2) target bundleno = 2875 (0xb3b), region = 40  ;;  %p324_p3 = scmp.lt.s32.totalorder (!%p278_p2), %s1025_s29, 15 }
   0x7   : > { %s1027_s9 = sshll.u32 (!%p278_p2), %s329_s30, 2  ;;  %p1033_p5 = scmp.ne.s32.totalorder (!%p278_p2), %s1222_s28, 0 }
   0x8   : > { %p331_p4 = scmp.lt.s32.totalorder (!%p278_p2), %s1027_s9, 15 }
   0xd   : > { %s1443_s29 = smov (!%p324_p3, %s1025_s29), 15  ;;  %s1445_s9 = smov (!%p331_p4, %s1027_s9), 15 }
   0xe   : > { %s1026_s10 = sshll.u32 %s1443_s29, 3  ;;  %s1028_s14 = sshll.u32 %s1445_s9, 3  ;;  %v356_v0 = vld [vmem:[%s1436_s3] sm:$0xff] (!%p1033_p5)  ;;  %vm357_vm0 = vcmask (!%p1033_p5), 523264   ;;  %vm361_vm1 = vcmask (!%p1033_p5), 261120   ;;  %v360_v2 = vld [vmem:[%s1437_s4 + $0x8] sm:$0xff] (!%p1033_p5) }
   0xf   : > { %s1231_s13 = scalar_lea.vmem %s1433_s0, %s1026_s10  ;;  %s1236_s17 = scalar_lea.vmem %s1434_s1, %s1028_s14  ;;  %v359_v1 = vld [vmem:[%s1437_s4] sm:$0xff] (!%p1033_p5)  ;;  %358 = vst.msk [vmem:[#allocation2] sm:$0xff] (!%p1033_p5), %vm357_vm0, %v356_v0 }
  0x10   : > { %s1241_s20 = scalar_lea.vmem %s1438_s5, %s1026_s10  ;;  %s1246_s23 = scalar_lea.vmem %s1439_s6, %s1028_s14  ;;  %362 = vst.msk [vmem:[#allocation3] sm:$0xff] (!%p1033_p5), %vm361_vm1, %v359_v1  ;;  %363 = vst.msk [vmem:[#allocation3 + $0x8] sm:$0xff] (!%p1033_p5), %vm361_vm1, %v360_v2 }
  0x11   : > { %355 = sbr.rel (%p1033_p5) target bundleno = 24 (0x18), region = 44 }
  0x18 PF: > { %v1083_v3 = vld [vmem:[%s1435_s2 + $0x4] ss:$8 sps:$4 sm:$0xff]   ;;  %v1264_v4 = vld [vmem:[%s1435_s2] ss:$8 sps:$4 sm:$0xff]   ;;  %v1167_v5 = vmov 0   ;;  %s1168_s24 = smov 32  }
  0x19   : > { %453 = vmatprep.mubr.bf16.mxu0 %v1167_v5  ;;  %575 = vmatprep.mubr.bf16.mxu1 %v1167_v5  ;;  %v1271_v6 = vld [vmem:[%s1435_s2 + $0x14] ss:$8 sps:$4 sm:$0xff]   ;;  %v1277_v7 = vld [vmem:[%s1435_s2 + $0x10] ss:$8 sps:$4 sm:$0xff]   ;;  %v1284_v8 = vld [vmem:[%s1435_s2 + $0x24] ss:$8 sps:$4 sm:$0xff]  }
  0x1a   : > { %421 = vmatprep.subr.bf16.mxu0 %v1083_v3  ;;  %543 = vmatprep.subr.bf16.mxu1 %v1083_v3  ;;  %v373_v9 = vld [vmem:[#allocation3] sm:$0xff]  ;;  %v375_v11 = vld [vmem:[#allocation3 + $0x8] sm:$0xff]  ;;  %v372_v14 = vld [vmem:[#allocation2] sm:$0xff]  ;;  %vm417_vm2 = vcmask 523264   ;;  %s1169_s11 = smov 64   ;;  %vm527_vm3 = vcmask 261120  }
  0x1b   : > { %422 = vmatpush1.bf16.msra.mxu0 %v1264_v4  ;;  %544 = vmatpush1.bf16.msra.mxu1 %v1264_v4  ;;  %v1292_v10 = vld [vmem:[%s1435_s2 + $0x20] ss:$8 sps:$4 sm:$0xff]   ;;  %v1299_v12 = vld [vmem:[%s1435_s2 + $0x34] ss:$8 sps:$4 sm:$0xff]   ;;  %v1307_v13 = vld [vmem:[%s1435_s2 + $0x30] ss:$8 sps:$4 sm:$0xff]   ;;  %v376_v15 = vpack.c.bf16 %v372_v14, %v372_v14 }
  0x1c   : > { %423 = vmatprep.subr.bf16.mxu0 %v1271_v6  ;;  %545 = vmatprep.subr.bf16.mxu1 %v1271_v6  ;;  %v462_v16 = vld [vmem:[%s1231_s13] sm:$0xff]  ;;  %v1043_v18 = vld [vmem:[%s1236_s17 + $0x18] sm:$0xff]  ;;  %v1048_v56 = vld [vmem:[%s1231_s13 + $0x8] sm:$0xff]  ;;  %p1066_p6 = scmp.ne.s32.totalorder %s1222_s28, 3 }
  0x1d   : > { %475 = vrot.lane.b32.xlu1 %v373_v9, %s1168_s24  ;;  %v1049_v57 = vld [vmem:[%s1236_s17 + $0x10] sm:$0xff] }
  0x1f   : > { %424 = vmatpush1.bf16.msra.mxu0 %v1277_v7  ;;  %546 = vmatpush1.bf16.msra.mxu1 %v1277_v7 }
  0x20   : > { %425 = vmatprep.subr.bf16.mxu0 %v1284_v8  ;;  %547 = vmatprep.subr.bf16.mxu1 %v1284_v8 }
  0x21   : > { %503 = vrot.lane.b32.xlu1 %v375_v11, %s1168_s24 }
  0x23   : > { %426 = vmatpush1.bf16.msra.mxu0 %v1292_v10  ;;  %548 = vmatpush1.bf16.msra.mxu1 %v1292_v10 }
  0x24   : > { %427 = vmatprep.subr.bf16.mxu0 %v1299_v12  ;;  %549 = vmatprep.subr.bf16.mxu1 %v1299_v12 }
  0x27   : > { %428 = vmatpush1.bf16.msra.mxu0 %v1307_v13  ;;  %550 = vmatpush1.bf16.msra.mxu1 %v1307_v13 }
  0x28   : > { %658 = vmatprep.subr.bf16.mxu0 %v1083_v3  ;;  %773 = vmatprep.subr.bf16.mxu1 %v1083_v3 }
  0x2a   : > { %1042 = vmatmul.mubr.msk.bf16.vlgmr.msra.gmra.mrb[0].mxu0 %vm417_vm2, %v376_v15 }
  0x2b   : > { %659 = vmatpush1.bf16.msra.mxu0 %v1264_v4  ;;  %690 = vmatprep.mubr.bf16.mxu0 %v1167_v5 }
  0x2c   : > { %660 = vmatprep.subr.bf16.mxu0 %v1271_v6 }
  0x2f   : > { %661 = vmatpush1.bf16.msra.mxu0 %v1277_v7 }
  0x30   : > { %662 = vmatprep.subr.bf16.mxu0 %v1284_v8 }
  0x33   : > { %663 = vmatpush1.bf16.msra.mxu0 %v1292_v10 }
  0x34   : > { %664 = vmatprep.subr.bf16.mxu0 %v1299_v12 }
  0x37   : > { %665 = vmatpush1.bf16.msra.mxu0 %v1307_v13 }
  0x8f   : > { %v476_v38 = vpop.permute.xlu1 %475 }
  0x93   : > { %v504_v40 = vpop.permute.xlu1 %503 }
  0xfd   : > { %v455_v17 = vpop.f32.mrb[0].mxu0 }
  0xfe   : > { %v463_v19 = vadd.f32 %v462_v16, %v455_v17  ;;  %v457_v20 = vpop.f32.mrb[1].mxu0 }
  0xff   : > { %v459_v21 = vpop.f32.mrb[2].mxu0  ;;  %v466_v22 = vadd.f32 %v1043_v18, %v457_v20 }
 0x100   : > { %1095 = vtanh.f32 %v463_v19  ;;  %v460_v23 = vpop.f32.mrb[3].mxu0  ;;  %v1044_v26 = vmul.f32 -1.442695, %v463_v19 }
 0x101   : > { %1097 = vtanh.f32 %v466_v22  ;;  %v1045_v27 = vmul.f32 -1.442695, %v466_v22 }
 0x102   : > { %1099 = vpow2.f32 %v1044_v26 }
 0x103   : > { %1101 = vpow2.f32 %v1045_v27 }
 0x10a   : > { %v1096_v24 = vpop.eup %1095 }
 0x10b   : > { %480 = vrot.lane.b32.xlu0 %v1096_v24, %s1169_s11  ;;  %v1098_v25 = vpop.eup %1097 }
 0x10c   : > { %v1100_v28 = vpop.eup %1099 }
 0x10d   : > { %v470_v29 = vadd.f32 1.0, %v1100_v28  ;;  %v1102_v30 = vpop.eup %1101 }
 0x10e   : > { %v498_v31 = vadd.f32 1.0, %v1102_v30  ;;  %v1055_v30 = vld [vmem:[%s1231_s13 + $0x10] sm:$0xff] }
 0x10f   : > { %508 = vrot.lane.b32.xlu0 %v1098_v25, %s1169_s11  ;;  %1103 = vrcp.f32 %v470_v29 }
 0x110   : > { %1105 = vrcp.f32 %v498_v31  ;;  %v1056_v31 = vld [vmem:[%s1236_s17 + $0x8] sm:$0xff] }
 0x119   : > { %v1104_v32 = vpop.eup %1103 }
 0x11a   : > { %v1106_v35 = vpop.eup %1105  ;;  %v478_v39 = vmul.f32 %v1104_v32, %v476_v38 }
 0x11b   : > { %v506_v43 = vmul.f32 %v1106_v35, %v504_v40 }
 0x17d   : > { %v481_v33 = vpop.permute.xlu0 %480 }
 0x17e   : > { %v483_v34 = vmul.f32 %v1104_v32, %v481_v33 }
 0x180   : > { %485 = vrot.lane.b32.xlu0 %v483_v34, %s1168_s24 }
 0x181   : > { %v509_v36 = vpop.permute.xlu0 %508 }
 0x182   : > { %v511_v37 = vmul.f32 %v1106_v35, %v509_v36 }
 0x184   : > { %513 = vrot.lane.b32.xlu1 %v511_v37, %s1168_s24 }
 0x1f2   : > { %v486_v41 = vpop.permute.xlu0 %485 }
 0x1f3   : > { %v1329_v42 = vadd.f32 %v486_v41, %v478_v39 }
 0x1f5   : > { %1107 = vtanh.f32 %v1329_v42 }
 0x1f6   : > { %v514_v44 = vpop.permute.xlu1 %513 }
 0x1f7   : > { %v516_v45 = vadd.f32 %v514_v44, %v506_v43 }
 0x1f9   : > { %1109 = vtanh.f32 %v516_v45 }
 0x1ff   : > { %v1108_v46 = vpop.eup %1107 }
 0x200   : > { %491 = vrot.lane.b32.xlu0 %v1108_v46, %s1169_s11 }
 0x203   : > { %v1110_v47 = vpop.eup %1109 }
 0x204   : > { %519 = vrot.lane.b32.xlu1 %v1110_v47, %s1169_s11 }
 0x272   : > { %v492_v48 = vpop.permute.xlu0 %491 }
 0x273   : > { %v494_v49 = vmul.f32 %v1104_v32, %v492_v48 }
 0x275   : > { %524 = vrot.lane.b32.xlu0 %v494_v49, %s1168_s24 }
 0x276   : > { %v520_v50 = vpop.permute.xlu1 %519 }
 0x277   : > { %v1335_v51 = vmul.f32 %v1106_v35, %v520_v50 }
 0x279   : > { %535 = vrot.lane.b32.xlu1 %v1335_v51, %s1169_s11 }
 0x2e7   : > { %v525_v52 = vpop.permute.xlu0 %524 }
 0x2e8   : > { %528 = vst.msk [vmem:[%s1241_s20] sm:$0xff] %vm527_vm3, %v525_v52 }
 0x2eb   : > { %v536_v53 = vpop.permute.xlu1 %535 }
 0x2ec   : > { %v538_v54 = vsel %vm527_vm3, %v525_v52, %v536_v53 }
 0x2ed   : > { %v539_v55 = vpack.c.bf16 %v538_v54, %v538_v54 }
 0x2ef   : > { %1047 = vmatmul.mubr.msk.bf16.vlgmr.msra.gmra.mrb[0].mxu1 %vm417_vm2, %v539_v55 }
 0x2f0   : > { %774 = vmatpush1.bf16.msra.mxu1 %v1264_v4  ;;  %805 = vmatprep.mubr.bf16.mxu1 %v1167_v5 }
 0x2f1   : > { %775 = vmatprep.subr.bf16.mxu1 %v1271_v6 }
 0x2f4   : > { %776 = vmatpush1.bf16.msra.mxu1 %v1277_v7 }
 0x2f5   : > { %777 = vmatprep.subr.bf16.mxu1 %v1284_v8 }
 0x2f8   : > { %778 = vmatpush1.bf16.msra.mxu1 %v1292_v10 }
 0x2f9   : > { %779 = vmatprep.subr.bf16.mxu1 %v1299_v12 }
 0x2fc   : > { %780 = vmatpush1.bf16.msra.mxu1 %v1307_v13 }
 0x3c2   : > { %v577_v58 = vpop.f32.mrb[0].mxu1 }
 0x3c3   : > { %v586_v59 = vadd.f32 %v1048_v56, %v577_v58  ;;  %v579_v60 = vpop.f32.mrb[1].mxu1 }
 0x3c4   : > { %v589_v61 = vadd.f32 %v1049_v57, %v579_v60  ;;  %v581_v62 = vpop.f32.mrb[2].mxu1 }
 0x3c5   : > { %1111 = vtanh.f32 %v586_v59  ;;  %v582_v63 = vpop.f32.mrb[3].mxu1  ;;  %v1050_v2 = vmul.f32 -1.442695, %v586_v59 }
 0x3c6   : > { %1113 = vtanh.f32 %v589_v61  ;;  %v1051_v3 = vmul.f32 -1.442695, %v589_v61 }
 0x3c7   : > { %1115 = vpow2.f32 %v1050_v2 }
 0x3c8   : > { %1117 = vpow2.f32 %v1051_v3 }
 0x3cf   : > { %v1112_v0 = vpop.eup %1111 }
 0x3d0   : > { %v1114_v1 = vpop.eup %1113  ;;  %599 = vrot.lane.b32.xlu0 %v1112_v0, %s1169_s11 }
 0x3d1   : > { %623 = vrot.lane.b32.xlu1 %v1114_v1, %s1169_s11  ;;  %v1116_v4 = vpop.eup %1115 }
 0x3d2   : > { %v1118_v5 = vpop.eup %1117  ;;  %v593_v6 = vadd.f32 1.0, %v1116_v4 }
 0x3d3   : > { %v617_v7 = vadd.f32 1.0, %v1118_v5  ;;  %v1062_v5 = vld [vmem:[%s1231_s13 + $0x18] sm:$0xff]  ;;  %s1170_s13 = smov 96  }
 0x3d4   : > { %1119 = vrcp.f32 %v593_v6  ;;  %v817_v6 = vld [vmem:[%s1236_s17] sm:$0xff] }
 0x3d5   : > { %1121 = vrcp.f32 %v617_v7 }
 0x3de   : > { %v1120_v8 = vpop.eup %1119 }
 0x3df   : > { %v1122_v10 = vpop.eup %1121  ;;  %v597_v14 = vmul.f32 %v1120_v8, %v1329_v42 }
 0x3e0   : > { %v621_v16 = vmul.f32 %v1122_v10, %v516_v45 }
 0x442   : > { %v600_v9 = vpop.permute.xlu0 %599 }
 0x443   : > { %v602_v11 = vmul.f32 %v1120_v8, %v600_v9  ;;  %v624_v12 = vpop.permute.xlu1 %623 }
 0x444   : > { %v626_v13 = vmul.f32 %v1122_v10, %v624_v12 }
 0x445   : > { %604 = vrot.lane.b32.xlu0 %v602_v11, %s1168_s24 }
 0x446   : > { %628 = vrot.lane.b32.xlu1 %v626_v13, %s1168_s24 }
 0x4b7   : > { %v605_v15 = vpop.permute.xlu0 %604 }
 0x4b8   : > { %v607_v17 = vadd.f32 %v605_v15, %v597_v14  ;;  %v629_v18 = vpop.permute.xlu1 %628 }
 0x4b9   : > { %v631_v19 = vadd.f32 %v629_v18, %v621_v16 }
 0x4ba   : > { %1123 = vtanh.f32 %v607_v17 }
 0x4bb   : > { %1125 = vtanh.f32 %v631_v19 }
 0x4c4   : > { %v1124_v20 = vpop.eup %1123 }
 0x4c5   : > { %v1126_v21 = vpop.eup %1125  ;;  %610 = vrot.lane.b32.xlu0 %v1124_v20, %s1169_s11 }
 0x4c6   : > { %634 = vrot.lane.b32.xlu1 %v1126_v21, %s1169_s11 }
 0x537   : > { %v611_v22 = vpop.permute.xlu0 %610 }
 0x538   : > { %v613_v23 = vmul.f32 %v1120_v8, %v611_v22  ;;  %v635_v24 = vpop.permute.xlu1 %634 }
 0x539   : > { %v1360_v25 = vmul.f32 %v1122_v10, %v635_v24 }
 0x53a   : > { %639 = vrot.lane.b32.xlu0 %v613_v23, %s1168_s24 }
 0x53b   : > { %650 = vrot.lane.b32.xlu1 %v1360_v25, %s1169_s11 }
 0x5ac   : > { %v640_v26 = vpop.permute.xlu0 %639 }
 0x5ad   : > { %1052 = vst.msk [vmem:[%s1241_s20 + $0x8] sm:$0xff] %vm527_vm3, %v640_v26  ;;  %v651_v27 = vpop.permute.xlu1 %650 }
 0x5ae   : > { %v653_v28 = vsel %vm527_vm3, %v640_v26, %v651_v27 }
 0x5af   : > { %v654_v29 = vpack.c.bf16 %v653_v28, %v653_v28 }
 0x5b1   : > { %1054 = vmatmul.mubr.msk.bf16.vlgmr.msra.gmra.mrb[4].mxu0 %vm417_vm2, %v654_v29 }
 0x684   : > { %v692_v32 = vpop.f32.mrb[4].mxu0 }
 0x685   : > { %v701_v33 = vadd.f32 %v1055_v30, %v692_v32  ;;  %v694_v34 = vpop.f32.mrb[5].mxu0 }
 0x686   : > { %v704_v35 = vadd.f32 %v1056_v31, %v694_v34  ;;  %v696_v36 = vpop.f32.mrb[6].mxu0 }
 0x687   : > { %1127 = vtanh.f32 %v701_v33  ;;  %v697_v37 = vpop.f32.mrb[7].mxu0  ;;  %v1057_v40 = vmul.f32 -1.442695, %v701_v33 }
 0x688   : > { %1129 = vtanh.f32 %v704_v35  ;;  %v1058_v41 = vmul.f32 -1.442695, %v704_v35 }
 0x689   : > { %1131 = vpow2.f32 %v1057_v40 }
 0x68a   : > { %1133 = vpow2.f32 %v1058_v41 }
 0x691   : > { %v1128_v38 = vpop.eup %1127 }
 0x692   : > { %v1130_v39 = vpop.eup %1129  ;;  %714 = vrot.lane.b32.xlu0 %v1128_v38, %s1169_s11 }
 0x693   : > { %738 = vrot.lane.b32.xlu1 %v1130_v39, %s1169_s11  ;;  %v1132_v42 = vpop.eup %1131 }
 0x694   : > { %v1134_v43 = vpop.eup %1133  ;;  %v708_v44 = vadd.f32 1.0, %v1132_v42 }
 0x695   : > { %v732_v45 = vadd.f32 1.0, %v1134_v43 }
 0x696   : > { %1135 = vrcp.f32 %v708_v44 }
 0x697   : > { %1137 = vrcp.f32 %v732_v45 }
 0x6a0   : > { %v1136_v46 = vpop.eup %1135 }
 0x6a1   : > { %v1138_v48 = vpop.eup %1137  ;;  %v712_v53 = vmul.f32 %v1136_v46, %v607_v17 }
 0x6a2   : > { %v736_v55 = vmul.f32 %v1138_v48, %v631_v19 }
 0x704   : > { %v715_v47 = vpop.permute.xlu0 %714 }
 0x705   : > { %v717_v49 = vmul.f32 %v1136_v46, %v715_v47  ;;  %v739_v50 = vpop.permute.xlu1 %738 }
 0x706   : > { %v741_v52 = vmul.f32 %v1138_v48, %v739_v50 }
 0x707   : > { %719 = vrot.lane.b32.xlu0 %v717_v49, %s1168_s24 }
 0x708   : > { %743 = vrot.lane.b32.xlu1 %v741_v52, %s1168_s24 }
 0x779   : > { %v720_v54 = vpop.permute.xlu0 %719 }
 0x77a   : > { %v722_v56 = vadd.f32 %v720_v54, %v712_v53  ;;  %v744_v57 = vpop.permute.xlu1 %743 }
 0x77b   : > { %v746_v58 = vadd.f32 %v744_v57, %v736_v55 }
 0x77c   : > { %1139 = vtanh.f32 %v722_v56 }
 0x77d   : > { %1141 = vtanh.f32 %v746_v58 }
 0x786   : > { %v1140_v59 = vpop.eup %1139 }
 0x787   : > { %v1142_v60 = vpop.eup %1141  ;;  %725 = vrot.lane.b32.xlu0 %v1140_v59, %s1169_s11 }
 0x788   : > { %749 = vrot.lane.b32.xlu1 %v1142_v60, %s1169_s11 }
 0x7f9   : > { %v726_v61 = vpop.permute.xlu0 %725 }
 0x7fa   : > { %v728_v62 = vmul.f32 %v1136_v46, %v726_v61  ;;  %v750_v63 = vpop.permute.xlu1 %749 }
 0x7fb   : > { %v752_v0 = vmul.f32 %v1138_v48, %v750_v63 }
 0x7fc   : > { %754 = vrot.lane.b32.xlu0 %v728_v62, %s1168_s24 }
 0x7fd   : > { %765 = vrot.lane.b32.xlu1 %v752_v0, %s1169_s11 }
 0x86e   : > { %v755_v1 = vpop.permute.xlu0 %754 }
 0x86f   : > { %1059 = vst.msk [vmem:[%s1241_s20 + $0x10] sm:$0xff] %vm527_vm3, %v755_v1  ;;  %v766_v2 = vpop.permute.xlu1 %765 }
 0x870   : > { %v768_v3 = vsel %vm527_vm3, %v755_v1, %v766_v2 }
 0x871   : > { %v769_v4 = vpack.c.bf16 %v768_v3, %v768_v3 }
 0x873   : > { %1061 = vmatmul.mubr.msk.bf16.vlgmr.msra.gmra.mrb[4].mxu1 %vm417_vm2, %v769_v4 }
 0x946   : > { %v807_v7 = vpop.f32.mrb[4].mxu1 }
 0x947   : > { %v816_v8 = vadd.f32 %v1062_v5, %v807_v7  ;;  %v809_v9 = vpop.f32.mrb[5].mxu1 }
 0x948   : > { %v818_v10 = vadd.f32 %v817_v6, %v809_v9  ;;  %v811_v11 = vpop.f32.mrb[6].mxu1 }
 0x949   : > { %1143 = vtanh.f32 %v816_v8  ;;  %v812_v12 = vpop.f32.mrb[7].mxu1  ;;  %v1063_v15 = vmul.f32 -1.442695, %v816_v8 }
 0x94a   : > { %1145 = vtanh.f32 %v818_v10  ;;  %v1064_v16 = vmul.f32 -1.442695, %v818_v10 }
 0x94b   : > { %1147 = vpow2.f32 %v1063_v15 }
 0x94c   : > { %1149 = vpow2.f32 %v1064_v16 }
 0x953   : > { %v1144_v13 = vpop.eup %1143 }
 0x954   : > { %v1146_v14 = vpop.eup %1145  ;;  %828 = vrot.lane.b32.xlu0 %v1144_v13, %s1169_s11 }
 0x955   : > { %852 = vrot.lane.b32.xlu1 %v1146_v14, %s1169_s11  ;;  %v1148_v17 = vpop.eup %1147 }
 0x956   : > { %v1150_v18 = vpop.eup %1149  ;;  %v822_v19 = vadd.f32 1.0, %v1148_v17 }
 0x957   : > { %v846_v20 = vadd.f32 1.0, %v1150_v18 }
 0x958   : > { %1151 = vrcp.f32 %v822_v19 }
 0x959   : > { %1153 = vrcp.f32 %v846_v20 }
 0x962   : > { %v1152_v21 = vpop.eup %1151 }
 0x963   : > { %v1154_v23 = vpop.eup %1153  ;;  %v826_v28 = vmul.f32 %v1152_v21, %v722_v56 }
 0x964   : > { %v850_v30 = vmul.f32 %v1154_v23, %v746_v58 }
 0x9c6   : > { %v829_v22 = vpop.permute.xlu0 %828 }
 0x9c7   : > { %v831_v24 = vmul.f32 %v1152_v21, %v829_v22  ;;  %v853_v26 = vpop.permute.xlu1 %852 }
 0x9c8   : > { %v855_v27 = vmul.f32 %v1154_v23, %v853_v26 }
 0x9c9   : > { %833 = vrot.lane.b32.xlu0 %v831_v24, %s1168_s24 }
 0x9ca   : > { %857 = vrot.lane.b32.xlu1 %v855_v27, %s1168_s24 }
 0xa3b   : > { %v834_v29 = vpop.permute.xlu0 %833 }
 0xa3c   : > { %v836_v31 = vadd.f32 %v834_v29, %v826_v28  ;;  %v858_v32 = vpop.permute.xlu1 %857 }
 0xa3d   : > { %v860_v33 = vadd.f32 %v858_v32, %v850_v30 }
 0xa3e   : > { %1155 = vtanh.f32 %v836_v31 }
 0xa3f   : > { %1157 = vtanh.f32 %v860_v33 }
 0xa48   : > { %v1156_v34 = vpop.eup %1155 }
 0xa49   : > { %v1158_v35 = vpop.eup %1157  ;;  %839 = vrot.lane.b32.xlu0 %v1156_v34, %s1169_s11 }
 0xa4a   : > { %863 = vrot.lane.b32.xlu1 %v1158_v35, %s1169_s11 }
 0xa4d   : > { %530 = vrot.lane.b32.xlu0 %v1335_v51, %s1168_s24 }
 0xa4e   : > { %645 = vrot.lane.b32.xlu1 %v1360_v25, %s1168_s24 }
 0xa51   : > { %760 = vrot.lane.b32.xlu0 %v752_v0, %s1168_s24 }
 0xabb   : > { %v840_v36 = vpop.permute.xlu0 %839 }
 0xabc   : > { %v842_v37 = vmul.f32 %v1152_v21, %v840_v36  ;;  %v864_v38 = vpop.permute.xlu1 %863 }
 0xabd   : > { %v866_v39 = vmul.f32 %v1154_v23, %v864_v38 }
 0xabe   : > { %868 = vrot.lane.b32.xlu0 %v842_v37, %s1168_s24 }
 0xabf   : > { %v531_v40 = vpop.permute.xlu0 %530  ;;  %878 = vrot.lane.b32.xlu1 %v866_v39, %s1169_s11 }
 0xac0   : > { %1046 = vst.msk [vmem:[%s1246_s23 + $0x18] sm:$0xff] %vm527_vm3, %v531_v40  ;;  %v646_v41 = vpop.permute.xlu1 %645 }
 0xac1   : > { %1053 = vst.msk [vmem:[%s1246_s23 + $0x10] sm:$0xff] %vm527_vm3, %v646_v41 }
 0xac2   : > { %884 = vrot.lane.b32.xlu0 %v836_v31, %s1170_s13 }
 0xac3   : > { %v761_v51 = vpop.permute.xlu0 %760  ;;  %874 = vrot.lane.b32.xlu1 %v866_v39, %s1168_s24 }
 0xac4   : > { %1060 = vst.msk [vmem:[%s1246_s23 + $0x8] sm:$0xff] %vm527_vm3, %v761_v51 }
 0xac7   : > { %889 = vrot.lane.b32.xlu1 %v860_v33, %s1170_s13 }
 0xb30   : > { %v869_v25 = vpop.permute.xlu0 %868 }
 0xb31   : > { %1065 = vst.msk [vmem:[%s1241_s20 + $0x18] sm:$0xff] %vm527_vm3, %v869_v25  ;;  %v879_v42 = vpop.permute.xlu1 %878  ;;  %897 = vst.msk [vmem:[%s1440_s7] sm:$0xff] (!%p1066_p6), %vm527_vm3, %v869_v25 }
 0xb32   : > { %v881_v43 = vsel %vm527_vm3, %v869_v25, %v879_v42 }
 0xb33   : > { %882 = vst.msk [vmem:[#allocation2] sm:$0xff] %vm417_vm2, %v881_v43 }
 0xb34   : > { %v885_v44 = vpop.permute.xlu0 %884  ;;  %896 = sbr.rel (%p1066_p6) target bundleno = 2875 (0xb3b), region = 48 }
 0xb35   : > { %887 = vst.msk [vmem:[#allocation3] sm:$0xff] %vm527_vm3, %v885_v44  ;;  %v875_v45 = vpop.permute.xlu1 %874  ;;  %900 = vst.msk [vmem:[%s1441_s8] sm:$0xff] (!%p1066_p6), %vm527_vm3, %v885_v44 }
 0xb36   : > { %877 = vst.msk [vmem:[%s1246_s23] sm:$0xff] %vm527_vm3, %v875_v45  ;;  %1067 = vst.msk [vmem:[%s1440_s7 + $0x8] sm:$0xff] (!%p1066_p6), %vm527_vm3, %v875_v45 }
 0xb39   : > { %v890_v46 = vpop.permute.xlu1 %889 }
 0xb3a   : > { %892 = vst.msk [vmem:[#allocation3 + $0x8] sm:$0xff] %vm527_vm3, %v890_v46  ;;  %1068 = vst.msk [vmem:[%s1441_s8 + $0x8] sm:$0xff] (!%p1066_p6), %vm527_vm3, %v890_v46 }
 0xb3b PF: > { %s19_s27 = sadd.s32 1, %s1165_s27  }
 0xb3c   : > { %p16_p7 = scmp.ge.s32.totalorder %s19_s27, 6  }
 0xb3e   :  { %18 = sbr.rel (!%p16_p7) target bundleno = 1 (0x1), region = 124 }

</bundles_post_ra>
